<compile_context>
chip_gen: v6e
topology: v6e:2x2x1
jax: 0.10.0
libtpu: 0.0.40
codegen_flags: <defaults>
</compile_context>

<pallas_src>
import functools
import math

import numpy as np
import jax
import jax.numpy as jnp
from jax.experimental import pallas as pl
from jax.experimental.pallas import tpu as pltpu


def _ssb_kernel(H, D, n_steps,
                x_ref, shift_ref, scale_ref, gate_ref,
                ca_ref, cb_ref, qs_ref, ks_ref,
                wqkv_ref, bqkv_ref, w2a_ref,
                wmlp_ref, bmlp_ref, w2m_ref, b2_ref,
                o_ref, xmod_ref, acc_ref):
    f32 = jnp.float32
    s = pl.program_id(1)
    cd = xmod_ref.dtype                     # matmul / storage compute dtype

    # ---- step 0: pre-LayerNorm + modulation (stored once), zero accumulator
    @pl.when(s == 0)
    def _init():
        x = x_ref[0].astype(f32)                               # (L, hid)
        mu = jnp.mean(x, axis=-1, keepdims=True)
        xc = x - mu
        var = jnp.mean(xc * xc, axis=-1, keepdims=True)
        ln = xc * jax.lax.rsqrt(var + 1e-6)
        xm = (1.0 + scale_ref[0].astype(f32)) * ln + shift_ref[0].astype(f32)
        xmod_ref[...] = xm.astype(cd)
        acc_ref[...] = jnp.zeros_like(acc_ref)

    xm = xmod_ref[...]                                         # (L, hid)

    # ---- attention phase: one head per grid step -------------------------
    @pl.when(s < H)
    def _attn_head():
        # fused per-head q/k/v projection: (L, hid) @ (hid, 3D)
        qkv = jnp.dot(xm, wqkv_ref[0],
                      preferred_element_type=f32) + bqkv_ref[0].astype(f32)
        q = qkv[:, :D]
        k = qkv[:, D:2 * D]
        v = qkv[:, 2 * D:]

        def rms(t, sc):
            return t * jax.lax.rsqrt(jnp.mean(t * t, axis=-1, keepdims=True)
                                     + 1e-6) * sc

        q = rms(q, qs_ref[...])        # qs already folds 1/sqrt(D) (wrapper)
        k = rms(k, ks_ref[...])

        ca = ca_ref[...]
        cb = cb_ref[...]

        def rope(t):
            # de-interleaved RoPE: partner lane is (j + D/2) mod D
            return ca * t + cb * pltpu.roll(t, D // 2, 1)

        q = rope(q)
        k = rope(k)

        sc = jax.lax.dot_general(q.astype(cd), k.astype(cd),
                                 (((1,), (1,)), ((), ())),
                                 preferred_element_type=f32)   # (L, L)
        sc = sc - jnp.max(sc, axis=-1, keepdims=True)
        p = jnp.exp(sc)
        denom = jnp.sum(p, axis=-1, keepdims=True)
        inv = pl.reciprocal(denom, approx=True)
        inv = inv * (2.0 - denom * inv)        # one Newton step -> f32 exact
        p = p * inv

        oh = jnp.dot(p.astype(cd), v.astype(cd),
                     preferred_element_type=f32)               # (L, D)
        # fold this head's slice of linear2 straight into the accumulator
        acc_ref[...] += jnp.dot(oh.astype(cd), w2a_ref[0],
                                preferred_element_type=f32)    # (L, hid)

    # ---- MLP phase: one M-tile per grid step ------------------------------
    @pl.when(s >= H)
    def _mlp_tile():
        h1 = jnp.dot(xm, wmlp_ref[...],
                     preferred_element_type=f32) + bmlp_ref[...].astype(f32)
        c = 0.7978845608028654                 # sqrt(2/pi), GELU tanh approx
        g = 0.5 * h1 * (1.0 + jnp.tanh(c * (h1 + 0.044715 * h1 * h1 * h1)))
        acc_ref[...] += jnp.dot(g.astype(cd), w2m_ref[...],
                                preferred_element_type=f32)

    # ---- finalize: bias, gated residual, write out ------------------------
    @pl.when(s == n_steps - 1)
    def _finalize():
        out = acc_ref[...] + b2_ref[...].astype(f32)
        res = x_ref[0].astype(f32) + gate_ref[0].astype(f32) * out
        # fp16_fix is a clamp for fp16 only -> no-op in f32
        o_ref[0] = res.astype(o_ref.dtype)


def single_stream_block(x, shift, scale, gate, pe, params, *,
                        mlp_tile=None, param_dtype=jnp.float32):
    B, L, hid = x.shape
    H = params["num_heads"]
    D = hid // H
    M = params["mlp_hidden"]
    assert D % 2 == 0

    if mlp_tile is None:
        mlp_tile = 256 if (M % 256 == 0) else M
    assert M % mlp_tile == 0
    MT = M // mlp_tile
    n_steps = H + MT

    w1 = params["w1"]
    b1 = params["b1"]
    w2 = params["w2"]
    b2 = params["b2"]

    # de-interleave permutation of the head dim: [0,2,...,D-2, 1,3,...,D-1]
    perm = np.concatenate([np.arange(0, D, 2), np.arange(1, D, 2)])

    # fused per-head qkv projection weights (q/k columns de-interleaved)
    wq = w1[:, :hid].reshape(hid, H, D).transpose(1, 0, 2)[:, :, perm]
    wk = w1[:, hid:2 * hid].reshape(hid, H, D).transpose(1, 0, 2)[:, :, perm]
    wv = w1[:, 2 * hid:3 * hid].reshape(hid, H, D).transpose(1, 0, 2)
    wqkv = jnp.concatenate([wq, wk, wv], axis=-1).astype(param_dtype)  # (H, hid, 3D)

    bq = b1[:hid].reshape(H, D)[:, perm]
    bk = b1[hid:2 * hid].reshape(H, D)[:, perm]
    bv = b1[2 * hid:3 * hid].reshape(H, D)
    bqkv = jnp.concatenate([bq, bk, bv], axis=-1).reshape(H, 1, 3 * D)

    wmlp = w1[:, 3 * hid:].astype(param_dtype)                 # (hid, M)
    bmlp = b1[3 * hid:].reshape(1, M)

    w2a = w2[:hid].reshape(H, D, hid).astype(param_dtype)      # (H, D, hid)
    w2m = w2[hid:].astype(param_dtype)                         # (M, hid)
    b2r = b2.reshape(1, hid)

    sm_scale = 1.0 / math.sqrt(D)
    qs = (params["q_scale"][perm] * sm_scale).reshape(1, D)    # fold softmax scale
    ks = params["k_scale"][perm].reshape(1, D)

    # pe: (1, 1, L, D//2, 2, 2) -> de-interleaved RoPE coefficient planes (L, D)
    pe = pe.astype(jnp.float32)
    ca = jnp.concatenate([pe[0, 0, :, :, 0, 0], pe[0, 0, :, :, 1, 1]], axis=-1)
    cb = jnp.concatenate([pe[0, 0, :, :, 0, 1], pe[0, 0, :, :, 1, 0]], axis=-1)

    b_map = lambda b, s: (b, 0, 0)
    const2 = lambda b, s: (0, 0)
    head_map = lambda b, s: (jnp.minimum(s, H - 1), 0, 0)      # clamp in MLP phase
    mlp_col = lambda b, s: (0, jnp.maximum(s - H, 0))          # clamp in attn phase
    mlp_row = lambda b, s: (jnp.maximum(s - H, 0), 0)

    in_specs = [
        pl.BlockSpec((1, L, hid), b_map),            # x
        pl.BlockSpec((1, 1, hid), b_map),            # mod.shift
        pl.BlockSpec((1, 1, hid), b_map),            # mod.scale
        pl.BlockSpec((1, 1, hid), b_map),            # mod.gate
        pl.BlockSpec((L, D), const2),                # RoPE ca
        pl.BlockSpec((L, D), const2),                # RoPE cb
        pl.BlockSpec((1, D), const2),                # q RMSNorm scale (* sm_scale)
        pl.BlockSpec((1, D), const2),                # k RMSNorm scale
        pl.BlockSpec((1, hid, 3 * D), head_map),     # wqkv   (per-head slice)
        pl.BlockSpec((1, 1, 3 * D), head_map),       # bqkv   (per-head slice)
        pl.BlockSpec((1, D, hid), head_map),         # w2 attn rows (per-head)
        pl.BlockSpec((hid, mlp_tile), mlp_col),      # wmlp   (per-M-tile)
        pl.BlockSpec((1, mlp_tile), mlp_col),        # bmlp   (per-M-tile)
        pl.BlockSpec((mlp_tile, hid), mlp_row),      # w2 mlp rows (per-M-tile)
        pl.BlockSpec((1, hid), const2),              # b2
    ]

    kernel = functools.partial(_ssb_kernel, H, D, n_steps)

    return pl.pallas_call(
        kernel,
        out_shape=jax.ShapeDtypeStruct((B, L, hid), x.dtype),
        grid=(B, n_steps),
        in_specs=in_specs,
        out_specs=pl.BlockSpec((1, L, hid), b_map),
        scratch_shapes=[
            pltpu.VMEM((L, hid), param_dtype),       # x_mod (modulated LN)
            pltpu.VMEM((L, hid), jnp.float32),       # residual accumulator
        ],
        compiler_params=pltpu.CompilerParams(
            dimension_semantics=("parallel", "arbitrary"),
            vmem_limit_bytes=64 * 1024 * 1024),
    )(x, shift, scale, gate, ca, cb, qs, ks,
      wqkv, bqkv, w2a, wmlp, bmlp, w2m, b2r)


def reference_forward(x, shift, scale, gate, pe, params):
    """Pure-JAX reference mirroring the PyTorch forward exactly."""
    B, L, hid = x.shape
    H = params["num_heads"]
    D = hid // H
    mu = x.mean(-1, keepdims=True)
    var = ((x - mu) ** 2).mean(-1, keepdims=True)
    ln = (x - mu) / jnp.sqrt(var + 1e-6)
    x_mod = (1.0 + scale) * ln + shift
    h1 = x_mod @ params["w1"] + params["b1"]
    qkv, mlp = h1[..., :3 * hid], h1[..., 3 * hid:]
    qkv = qkv.reshape(B, L, 3, H, D).transpose(2, 0, 3, 1, 4)
    q, k, v = qkv[0], qkv[1], qkv[2]                           # (B, H, L, D)

    def rms(t, s):
        return t * jax.lax.rsqrt((t * t).mean(-1, keepdims=True) + 1e-6) * s

    q = rms(q, params["q_scale"])
    k = rms(k, params["k_scale"])

    def rope(t):
        t_ = t.reshape(B, H, L, D // 2, 1, 2)
        out = pe[..., 0] * t_[..., 0] + pe[..., 1] * t_[..., 1]
        return out.reshape(B, H, L, D)

    q, k = rope(q), rope(k)
    s = jnp.einsum("bhld,bhmd->bhlm", q, k) / math.sqrt(D)
    pmat = jax.nn.softmax(s, axis=-1)
    o = jnp.einsum("bhlm,bhmd->bhld", pmat, v)
    attn = o.transpose(0, 2, 1, 3).reshape(B, L, H * D)
    c = math.sqrt(2.0 / math.pi)
    g = 0.5 * mlp * (1.0 + jnp.tanh(c * (mlp + 0.044715 * mlp ** 3)))
    out = jnp.concatenate([attn, g], axis=-1) @ params["w2"] + params["b2"]
    return x + gate * out


if __name__ == "__main__":
    # small but TPU-friendly shapes: head_dim = 128 so per-head tiles are
    # lane-aligned and the RoPE lane-rotate is a native 128-lane roll.
    B, L, hid, H = 2, 16, 256, 2
    D = hid // H
    M = int(hid * 4.0)                  # mlp_ratio = 4.0

    key = jax.random.PRNGKey(0)
    kk = jax.random.split(key, 11)
    x = jax.random.normal(kk[0], (B, L, hid), jnp.float32)
    shift = 0.1 * jax.random.normal(kk[1], (B, 1, hid), jnp.float32)
    scale = 0.1 * jax.random.normal(kk[2], (B, 1, hid), jnp.float32)
    gate = 0.1 * jax.random.normal(kk[3], (B, 1, hid), jnp.float32)
    pe = jax.random.normal(kk[4], (1, 1, L, D // 2, 2, 2), jnp.float32)

    params = dict(
        num_heads=H,
        mlp_hidden=M,
        w1=0.05 * jax.random.normal(kk[5], (hid, 3 * hid + M), jnp.float32),
        b1=0.05 * jax.random.normal(kk[6], (3 * hid + M,), jnp.float32),
        w2=0.05 * jax.random.normal(kk[7], (hid + M, hid), jnp.float32),
        b2=0.05 * jax.random.normal(kk[8], (hid,), jnp.float32),
        # learnable RMSNorm scales (perturbed so the de-interleave is exercised)
        q_scale=1.0 + 0.05 * jax.random.normal(kk[9], (D,), jnp.float32),
        k_scale=1.0 + 0.05 * jax.random.normal(kk[10], (D,), jnp.float32),
    )

    out = single_stream_block(x, shift, scale, gate, pe, params)
    out = jax.block_until_ready(out)

    ref = reference_forward(x, shift, scale, gate, pe, params)
    err = float(jnp.max(jnp.abs(out - ref)))
    assert jnp.allclose(out, ref, atol=1e-3, rtol=1e-3), f"max abs err {err}"
    print("KERNEL_OK")
</pallas_src>

<mosaic_0001>
module attributes {stable_mosaic.version = 11 : i64} {
  func.func @_ssb_kernel(%arg0: i32, %arg1: i32, %arg2: memref<1x16x256xf32, #tpu.memory_space<vmem>>, %arg3: memref<1x1x256xf32, #tpu.memory_space<vmem>>, %arg4: memref<1x1x256xf32, #tpu.memory_space<vmem>>, %arg5: memref<1x1x256xf32, #tpu.memory_space<vmem>>, %arg6: memref<16x128xf32, #tpu.memory_space<vmem>>, %arg7: memref<16x128xf32, #tpu.memory_space<vmem>>, %arg8: memref<1x128xf32, #tpu.memory_space<vmem>>, %arg9: memref<1x128xf32, #tpu.memory_space<vmem>>, %arg10: memref<1x256x384xf32, #tpu.memory_space<vmem>>, %arg11: memref<1x1x384xf32, #tpu.memory_space<vmem>>, %arg12: memref<1x128x256xf32, #tpu.memory_space<vmem>>, %arg13: memref<256x256xf32, #tpu.memory_space<vmem>>, %arg14: memref<1x256xf32, #tpu.memory_space<vmem>>, %arg15: memref<256x256xf32, #tpu.memory_space<vmem>>, %arg16: memref<1x256xf32, #tpu.memory_space<vmem>>, %arg17: memref<1x16x256xf32, #tpu.memory_space<vmem>>, %arg18: memref<16x256xf32, #tpu.memory_space<vmem>>, %arg19: memref<16x256xf32, #tpu.memory_space<vmem>>) attributes {dimension_semantics = [#tpu.dimension_semantics<parallel>, #tpu.dimension_semantics<arbitrary>], iteration_bounds = array<i64: 2, 6>, scalar_prefetch = 0 : i64, scratch_operands = 2 : i64, tpu.core_type = #tpu.core_type<tc>, window_params = [{transform_indices = @transform_0, window_bounds = array<i64: 1, 16, 256>}, {transform_indices = @transform_1, window_bounds = array<i64: 1, 1, 256>}, {transform_indices = @transform_2, window_bounds = array<i64: 1, 1, 256>}, {transform_indices = @transform_3, window_bounds = array<i64: 1, 1, 256>}, {pipeline_mode = #tpu.pipeline_mode<synchronous>, transform_indices = @transform_4, window_bounds = array<i64: 16, 128>}, {pipeline_mode = #tpu.pipeline_mode<synchronous>, transform_indices = @transform_5, window_bounds = array<i64: 16, 128>}, {pipeline_mode = #tpu.pipeline_mode<synchronous>, transform_indices = @transform_6, window_bounds = array<i64: 1, 128>}, {pipeline_mode = #tpu.pipeline_mode<synchronous>, transform_indices = @transform_7, window_bounds = array<i64: 1, 128>}, {transform_indices = @transform_8, window_bounds = array<i64: 1, 256, 384>}, {transform_indices = @transform_9, window_bounds = array<i64: 1, 1, 384>}, {transform_indices = @transform_10, window_bounds = array<i64: 1, 128, 256>}, {transform_indices = @transform_11, window_bounds = array<i64: 256, 256>}, {transform_indices = @transform_12, window_bounds = array<i64: 1, 256>}, {transform_indices = @transform_13, window_bounds = array<i64: 256, 256>}, {pipeline_mode = #tpu.pipeline_mode<synchronous>, transform_indices = @transform_14, window_bounds = array<i64: 1, 256>}, {transform_indices = @transform_15, window_bounds = array<i64: 1, 16, 256>}]} {
    %c0_i32 = arith.constant 0 : i32
    %0 = arith.cmpi eq, %arg1, %c0_i32 : i32
    %1 = arith.extui %0 : i1 to i32
    %c0_i32_0 = arith.constant 0 : i32
    %2 = arith.cmpi ne, %1, %c0_i32_0 : i32
    scf.if %2 {
      %c0_6 = arith.constant 0 : index
      %c0_7 = arith.constant 0 : index
      %c0_8 = arith.constant 0 : index
      %13 = vector.load %arg2[%c0_6, %c0_7, %c0_8] : memref<1x16x256xf32, #tpu.memory_space<vmem>>, vector<1x16x256xf32>
      %14 = vector.shape_cast %13 : vector<1x16x256xf32> to vector<16x256xf32>
      %cst = arith.constant dense<0.000000e+00> : vector<16xf32>
      %15 = vector.multi_reduction <add>, %14, %cst [1] : vector<16x256xf32> to vector<16xf32>
      %16 = vector.shape_cast %15 : vector<16xf32> to vector<16x1xf32>
      %cst_9 = arith.constant 2.560000e+02 : f32
      %17 = vector.broadcast %cst_9 : f32 to vector<16x1xf32>
      %18 = arith.divf %16, %17 : vector<16x1xf32>
      %19 = vector.broadcast %18 : vector<16x1xf32> to vector<16x256xf32>
      %20 = arith.subf %14, %19 : vector<16x256xf32>
      %21 = arith.mulf %20, %20 : vector<16x256xf32>
      %cst_10 = arith.constant dense<0.000000e+00> : vector<16xf32>
      %22 = vector.multi_reduction <add>, %21, %cst_10 [1] : vector<16x256xf32> to vector<16xf32>
      %23 = vector.shape_cast %22 : vector<16xf32> to vector<16x1xf32>
      %cst_11 = arith.constant 2.560000e+02 : f32
      %24 = vector.broadcast %cst_11 : f32 to vector<16x1xf32>
      %25 = arith.divf %23, %24 : vector<16x1xf32>
      %cst_12 = arith.constant 9.99999997E-7 : f32
      %26 = vector.broadcast %cst_12 : f32 to vector<16x1xf32>
      %27 = arith.addf %25, %26 : vector<16x1xf32>
      %28 = math.rsqrt %27 : vector<16x1xf32>
      %29 = vector.broadcast %28 : vector<16x1xf32> to vector<16x256xf32>
      %30 = arith.mulf %20, %29 : vector<16x256xf32>
      %c0_13 = arith.constant 0 : index
      %c0_14 = arith.constant 0 : index
      %c0_15 = arith.constant 0 : index
      %31 = vector.load %arg4[%c0_13, %c0_14, %c0_15] : memref<1x1x256xf32, #tpu.memory_space<vmem>>, vector<1x1x256xf32>
      %32 = vector.shape_cast %31 : vector<1x1x256xf32> to vector<1x256xf32>
      %cst_16 = arith.constant 1.000000e+00 : f32
      %33 = vector.broadcast %cst_16 : f32 to vector<1x256xf32>
      %34 = arith.addf %33, %32 : vector<1x256xf32>
      %35 = vector.broadcast %34 : vector<1x256xf32> to vector<16x256xf32>
      %36 = arith.mulf %35, %30 : vector<16x256xf32>
      %c0_17 = arith.constant 0 : index
      %c0_18 = arith.constant 0 : index
      %c0_19 = arith.constant 0 : index
      %37 = vector.load %arg3[%c0_17, %c0_18, %c0_19] : memref<1x1x256xf32, #tpu.memory_space<vmem>>, vector<1x1x256xf32>
      %38 = vector.shape_cast %37 : vector<1x1x256xf32> to vector<1x256xf32>
      %39 = vector.broadcast %38 : vector<1x256xf32> to vector<16x256xf32>
      %40 = arith.addf %36, %39 : vector<16x256xf32>
      %c0_20 = arith.constant 0 : index
      %c0_21 = arith.constant 0 : index
      %41 = vector.load %arg18[%c0_20, %c0_21] : memref<16x256xf32, #tpu.memory_space<vmem>>, vector<16x256xf32>
      tpu.vector_store %arg18[%c0_20, %c0_21], %40 {strides = array<i32>} : memref<16x256xf32, #tpu.memory_space<vmem>>, vector<16x256xf32>,
      %cst_22 = arith.constant 0.000000e+00 : f32
      %42 = vector.broadcast %cst_22 : f32 to vector<16x256xf32>
      %c0_23 = arith.constant 0 : index
      %c0_24 = arith.constant 0 : index
      %43 = vector.load %arg19[%c0_23, %c0_24] : memref<16x256xf32, #tpu.memory_space<vmem>>, vector<16x256xf32>
      tpu.vector_store %arg19[%c0_23, %c0_24], %42 {strides = array<i32>} : memref<16x256xf32, #tpu.memory_space<vmem>>, vector<16x256xf32>,
    } else {
    }
    %c0 = arith.constant 0 : index
    %c0_1 = arith.constant 0 : index
    %3 = vector.load %arg18[%c0, %c0_1] : memref<16x256xf32, #tpu.memory_space<vmem>>, vector<16x256xf32>
    %c2_i32 = arith.constant 2 : i32
    %4 = arith.cmpi slt, %arg1, %c2_i32 : i32
    %5 = arith.extui %4 : i1 to i32
    %c0_i32_2 = arith.constant 0 : i32
    %6 = arith.cmpi ne, %5, %c0_i32_2 : i32
    scf.if %6 {
      %c0_6 = arith.constant 0 : index
      %c0_7 = arith.constant 0 : index
      %c0_8 = arith.constant 0 : index
      %13 = vector.load %arg10[%c0_6, %c0_7, %c0_8] : memref<1x256x384xf32, #tpu.memory_space<vmem>>, vector<1x256x384xf32>
      %14 = vector.shape_cast %13 : vector<1x256x384xf32> to vector<256x384xf32>
      %cst = arith.constant dense<0.000000e+00> : vector<16x384xf32>
      %15 = tpu.matmul %3, %14, %cst {dimension_numbers = #tpu.dot_dimension_numbers<[1], [0], [0], [1], [0, 0, 1, 1], [], []>} : vector<16x256xf32>, vector<256x384xf32>, vector<16x384xf32> -> vector<16x384xf32>
      %c0_9 = arith.constant 0 : index
      %c0_10 = arith.constant 0 : index
      %c0_11 = arith.constant 0 : index
      %16 = vector.load %arg11[%c0_9, %c0_10, %c0_11] : memref<1x1x384xf32, #tpu.memory_space<vmem>>, vector<1x1x384xf32>
      %17 = vector.shape_cast %16 : vector<1x1x384xf32> to vector<1x384xf32>
      %18 = vector.broadcast %17 : vector<1x384xf32> to vector<16x384xf32>
      %19 = arith.addf %15, %18 : vector<16x384xf32>
      %20 = vector.extract_strided_slice %19 {offsets = [0, 0], sizes = [16, 128], strides = [1, 1]} : vector<16x384xf32> to vector<16x128xf32>
      %21 = vector.extract_strided_slice %19 {offsets = [0, 128], sizes = [16, 128], strides = [1, 1]} : vector<16x384xf32> to vector<16x128xf32>
      %22 = vector.extract_strided_slice %19 {offsets = [0, 256], sizes = [16, 128], strides = [1, 1]} : vector<16x384xf32> to vector<16x128xf32>
      %c0_12 = arith.constant 0 : index
      %c0_13 = arith.constant 0 : index
      %23 = vector.load %arg8[%c0_12, %c0_13] : memref<1x128xf32, #tpu.memory_space<vmem>>, vector<1x128xf32>
      %24 = arith.mulf %20, %20 : vector<16x128xf32>
      %cst_14 = arith.constant dense<0.000000e+00> : vector<16xf32>
      %25 = vector.multi_reduction <add>, %24, %cst_14 [1] : vector<16x128xf32> to vector<16xf32>
      %26 = vector.shape_cast %25 : vector<16xf32> to vector<16x1xf32>
      %cst_15 = arith.constant 1.280000e+02 : f32
      %27 = vector.broadcast %cst_15 : f32 to vector<16x1xf32>
      %28 = arith.divf %26, %27 : vector<16x1xf32>
      %cst_16 = arith.constant 9.99999997E-7 : f32
      %29 = vector.broadcast %cst_16 : f32 to vector<16x1xf32>
      %30 = arith.addf %28, %29 : vector<16x1xf32>
      %31 = math.rsqrt %30 : vector<16x1xf32>
      %32 = vector.broadcast %31 : vector<16x1xf32> to vector<16x128xf32>
      %33 = arith.mulf %20, %32 : vector<16x128xf32>
      %34 = vector.broadcast %23 : vector<1x128xf32> to vector<16x128xf32>
      %35 = arith.mulf %33, %34 : vector<16x128xf32>
      %c0_17 = arith.constant 0 : index
      %c0_18 = arith.constant 0 : index
      %36 = vector.load %arg9[%c0_17, %c0_18] : memref<1x128xf32, #tpu.memory_space<vmem>>, vector<1x128xf32>
      %37 = arith.mulf %21, %21 : vector<16x128xf32>
      %cst_19 = arith.constant dense<0.000000e+00> : vector<16xf32>
      %38 = vector.multi_reduction <add>, %37, %cst_19 [1] : vector<16x128xf32> to vector<16xf32>
      %39 = vector.shape_cast %38 : vector<16xf32> to vector<16x1xf32>
      %cst_20 = arith.constant 1.280000e+02 : f32
      %40 = vector.broadcast %cst_20 : f32 to vector<16x1xf32>
      %41 = arith.divf %39, %40 : vector<16x1xf32>
      %cst_21 = arith.constant 9.99999997E-7 : f32
      %42 = vector.broadcast %cst_21 : f32 to vector<16x1xf32>
      %43 = arith.addf %41, %42 : vector<16x1xf32>
      %44 = math.rsqrt %43 : vector<16x1xf32>
      %45 = vector.broadcast %44 : vector<16x1xf32> to vector<16x128xf32>
      %46 = arith.mulf %21, %45 : vector<16x128xf32>
      %47 = vector.broadcast %36 : vector<1x128xf32> to vector<16x128xf32>
      %48 = arith.mulf %46, %47 : vector<16x128xf32>
      %c0_22 = arith.constant 0 : index
      %c0_23 = arith.constant 0 : index
      %49 = vector.load %arg6[%c0_22, %c0_23] : memref<16x128xf32, #tpu.memory_space<vmem>>, vector<16x128xf32>
      %c0_24 = arith.constant 0 : index
      %c0_25 = arith.constant 0 : index
      %50 = vector.load %arg7[%c0_24, %c0_25] : memref<16x128xf32, #tpu.memory_space<vmem>>, vector<16x128xf32>
      %51 = arith.mulf %49, %35 : vector<16x128xf32>
      %c64_i32 = arith.constant 64 : i32
      %52 = tpu.dynamic_rotate %35 by %c64_i32 dim 1 : vector<16x128xf32>, i32 -> vector<16x128xf32>
      %53 = arith.mulf %50, %52 : vector<16x128xf32>
      %54 = arith.addf %51, %53 : vector<16x128xf32>
      %55 = arith.mulf %49, %48 : vector<16x128xf32>
      %c64_i32_26 = arith.constant 64 : i32
      %56 = tpu.dynamic_rotate %48 by %c64_i32_26 dim 1 : vector<16x128xf32>, i32 -> vector<16x128xf32>
      %57 = arith.mulf %50, %56 : vector<16x128xf32>
      %58 = arith.addf %55, %57 : vector<16x128xf32>
      %cst_27 = arith.constant dense<0.000000e+00> : vector<16x16xf32>
      %59 = tpu.matmul %54, %58, %cst_27 {dimension_numbers = #tpu.dot_dimension_numbers<[1], [1], [0], [0], [0, 0, 1, 0], [], []>} : vector<16x128xf32>, vector<16x128xf32>, vector<16x16xf32> -> vector<16x16xf32>
      %cst_28 = arith.constant dense<0xFF800000> : vector<16xf32>
      %60 = vector.multi_reduction <maximumf>, %59, %cst_28 [1] : vector<16x16xf32> to vector<16xf32>
      %61 = vector.shape_cast %60 : vector<16xf32> to vector<16x1xf32>
      %62 = vector.broadcast %61 : vector<16x1xf32> to vector<16x16xf32>
      %63 = arith.subf %59, %62 : vector<16x16xf32>
      %64 = math.exp %63 : vector<16x16xf32>
      %cst_29 = arith.constant dense<0.000000e+00> : vector<16xf32>
      %65 = vector.multi_reduction <add>, %64, %cst_29 [1] : vector<16x16xf32> to vector<16xf32>
      %66 = vector.shape_cast %65 : vector<16xf32> to vector<16x1xf32>
      %67 = tpu.reciprocal %66 {approx = true} : vector<16x1xf32> -> vector<16x1xf32>
      %68 = arith.mulf %66, %67 : vector<16x1xf32>
      %cst_30 = arith.constant 2.000000e+00 : f32
      %69 = vector.broadcast %cst_30 : f32 to vector<16x1xf32>
      %70 = arith.subf %69, %68 : vector<16x1xf32>
      %71 = arith.mulf %67, %70 : vector<16x1xf32>
      %72 = vector.broadcast %71 : vector<16x1xf32> to vector<16x16xf32>
      %73 = arith.mulf %64, %72 : vector<16x16xf32>
      %cst_31 = arith.constant dense<0.000000e+00> : vector<16x128xf32>
      %74 = tpu.matmul %73, %22, %cst_31 {dimension_numbers = #tpu.dot_dimension_numbers<[1], [0], [0], [1], [0, 0, 1, 1], [], []>} : vector<16x16xf32>, vector<16x128xf32>, vector<16x128xf32> -> vector<16x128xf32>
      %c0_32 = arith.constant 0 : index
      %c0_33 = arith.constant 0 : index
      %75 = vector.load %arg19[%c0_32, %c0_33] : memref<16x256xf32, #tpu.memory_space<vmem>>, vector<16x256xf32>
      %c0_34 = arith.constant 0 : index
      %c0_35 = arith.constant 0 : index
      %c0_36 = arith.constant 0 : index
      %76 = vector.load %arg12[%c0_34, %c0_35, %c0_36] : memref<1x128x256xf32, #tpu.memory_space<vmem>>, vector<1x128x256xf32>
      %77 = vector.shape_cast %76 : vector<1x128x256xf32> to vector<128x256xf32>
      %cst_37 = arith.constant dense<0.000000e+00> : vector<16x256xf32>
      %78 = tpu.matmul %74, %77, %cst_37 {dimension_numbers = #tpu.dot_dimension_numbers<[1], [0], [0], [1], [0, 0, 1, 1], [], []>} : vector<16x128xf32>, vector<128x256xf32>, vector<16x256xf32> -> vector<16x256xf32>
      %79 = arith.addf %75, %78 : vector<16x256xf32>
      %c0_38 = arith.constant 0 : index
      %c0_39 = arith.constant 0 : index
      %80 = vector.load %arg19[%c0_38, %c0_39] : memref<16x256xf32, #tpu.memory_space<vmem>>, vector<16x256xf32>
      tpu.vector_store %arg19[%c0_38, %c0_39], %79 {strides = array<i32>} : memref<16x256xf32, #tpu.memory_space<vmem>>, vector<16x256xf32>,
    } else {
    }
    %c2_i32_3 = arith.constant 2 : i32
    %7 = arith.cmpi sge, %arg1, %c2_i32_3 : i32
    %8 = arith.extui %7 : i1 to i32
    %c0_i32_4 = arith.constant 0 : i32
    %9 = arith.cmpi ne, %8, %c0_i32_4 : i32
    scf.if %9 {
      %c0_6 = arith.constant 0 : index
      %c0_7 = arith.constant 0 : index
      %13 = vector.load %arg13[%c0_6, %c0_7] : memref<256x256xf32, #tpu.memory_space<vmem>>, vector<256x256xf32>
      %cst = arith.constant dense<0.000000e+00> : vector<16x256xf32>
      %14 = tpu.matmul %3, %13, %cst {dimension_numbers = #tpu.dot_dimension_numbers<[1], [0], [0], [1], [0, 0, 1, 1], [], []>} : vector<16x256xf32>, vector<256x256xf32>, vector<16x256xf32> -> vector<16x256xf32>
      %c0_8 = arith.constant 0 : index
      %c0_9 = arith.constant 0 : index
      %15 = vector.load %arg14[%c0_8, %c0_9] : memref<1x256xf32, #tpu.memory_space<vmem>>, vector<1x256xf32>
      %16 = vector.broadcast %15 : vector<1x256xf32> to vector<16x256xf32>
      %17 = arith.addf %14, %16 : vector<16x256xf32>
      %cst_10 = arith.constant 5.000000e-01 : f32
      %18 = vector.broadcast %cst_10 : f32 to vector<16x256xf32>
      %19 = arith.mulf %18, %17 : vector<16x256xf32>
      %cst_11 = arith.constant 4.471500e-02 : f32
      %20 = vector.broadcast %cst_11 : f32 to vector<16x256xf32>
      %21 = arith.mulf %20, %17 : vector<16x256xf32>
      %22 = arith.mulf %21, %17 : vector<16x256xf32>
      %23 = arith.mulf %22, %17 : vector<16x256xf32>
      %24 = arith.addf %17, %23 : vector<16x256xf32>
      %cst_12 = arith.constant 0.797884583 : f32
      %25 = vector.broadcast %cst_12 : f32 to vector<16x256xf32>
      %26 = arith.mulf %25, %24 : vector<16x256xf32>
      %27 = math.tanh %26 : vector<16x256xf32>
      %cst_13 = arith.constant 1.000000e+00 : f32
      %28 = vector.broadcast %cst_13 : f32 to vector<16x256xf32>
      %29 = arith.addf %28, %27 : vector<16x256xf32>
      %30 = arith.mulf %19, %29 : vector<16x256xf32>
      %c0_14 = arith.constant 0 : index
      %c0_15 = arith.constant 0 : index
      %31 = vector.load %arg19[%c0_14, %c0_15] : memref<16x256xf32, #tpu.memory_space<vmem>>, vector<16x256xf32>
      %c0_16 = arith.constant 0 : index
      %c0_17 = arith.constant 0 : index
      %32 = vector.load %arg15[%c0_16, %c0_17] : memref<256x256xf32, #tpu.memory_space<vmem>>, vector<256x256xf32>
      %cst_18 = arith.constant dense<0.000000e+00> : vector<16x256xf32>
      %33 = tpu.matmul %30, %32, %cst_18 {dimension_numbers = #tpu.dot_dimension_numbers<[1], [0], [0], [1], [0, 0, 1, 1], [], []>} : vector<16x256xf32>, vector<256x256xf32>, vector<16x256xf32> -> vector<16x256xf32>
      %34 = arith.addf %31, %33 : vector<16x256xf32>
      %c0_19 = arith.constant 0 : index
      %c0_20 = arith.constant 0 : index
      %35 = vector.load %arg19[%c0_19, %c0_20] : memref<16x256xf32, #tpu.memory_space<vmem>>, vector<16x256xf32>
      tpu.vector_store %arg19[%c0_19, %c0_20], %34 {strides = array<i32>} : memref<16x256xf32, #tpu.memory_space<vmem>>, vector<16x256xf32>,
    } else {
    }
    %c5_i32 = arith.constant 5 : i32
    %10 = arith.cmpi eq, %arg1, %c5_i32 : i32
    %11 = arith.extui %10 : i1 to i32
    %c0_i32_5 = arith.constant 0 : i32
    %12 = arith.cmpi ne, %11, %c0_i32_5 : i32
    scf.if %12 {
      %c0_6 = arith.constant 0 : index
      %c0_7 = arith.constant 0 : index
      %13 = vector.load %arg19[%c0_6, %c0_7] : memref<16x256xf32, #tpu.memory_space<vmem>>, vector<16x256xf32>
      %c0_8 = arith.constant 0 : index
      %c0_9 = arith.constant 0 : index
      %14 = vector.load %arg16[%c0_8, %c0_9] : memref<1x256xf32, #tpu.memory_space<vmem>>, vector<1x256xf32>
      %15 = vector.broadcast %14 : vector<1x256xf32> to vector<16x256xf32>
      %16 = arith.addf %13, %15 : vector<16x256xf32>
      %c0_10 = arith.constant 0 : index
      %c0_11 = arith.constant 0 : index
      %c0_12 = arith.constant 0 : index
      %17 = vector.load %arg2[%c0_10, %c0_11, %c0_12] : memref<1x16x256xf32, #tpu.memory_space<vmem>>, vector<1x16x256xf32>
      %18 = vector.shape_cast %17 : vector<1x16x256xf32> to vector<16x256xf32>
      %c0_13 = arith.constant 0 : index
      %c0_14 = arith.constant 0 : index
      %c0_15 = arith.constant 0 : index
      %19 = vector.load %arg5[%c0_13, %c0_14, %c0_15] : memref<1x1x256xf32, #tpu.memory_space<vmem>>, vector<1x1x256xf32>
      %20 = vector.shape_cast %19 : vector<1x1x256xf32> to vector<1x256xf32>
      %21 = vector.broadcast %20 : vector<1x256xf32> to vector<16x256xf32>
      %22 = arith.mulf %21, %16 : vector<16x256xf32>
      %23 = arith.addf %18, %22 : vector<16x256xf32>
      %c0_16 = arith.constant 0 : index
      %c0_17 = arith.constant 0 : index
      %c0_18 = arith.constant 0 : index
      %24 = vector.load %arg17[%c0_16, %c0_17, %c0_18] : memref<1x16x256xf32, #tpu.memory_space<vmem>>, vector<1x16x256xf32>
      %25 = vector.shape_cast %24 : vector<1x16x256xf32> to vector<16x256xf32>
      %26 = vector.shape_cast %23 : vector<16x256xf32> to vector<1x16x256xf32>
      tpu.vector_store %arg17[%c0_16, %c0_17, %c0_18], %26 {strides = array<i32>} : memref<1x16x256xf32, #tpu.memory_space<vmem>>, vector<1x16x256xf32>,
    } else {
    }
    return
  }
  func.func @transform_0(%arg0: i32, %arg1: i32) -> (i32, i32, i32) {
    %c0_i32 = arith.constant 0 : i32
    %c0_i32_0 = arith.constant 0 : i32
    %c0_i32_1 = arith.constant 0 : i32
    return %arg0, %c0_i32, %c0_i32_0 : i32, i32, i32
  }
  func.func @transform_1(%arg0: i32, %arg1: i32) -> (i32, i32, i32) {
    %c0_i32 = arith.constant 0 : i32
    %c0_i32_0 = arith.constant 0 : i32
    %c0_i32_1 = arith.constant 0 : i32
    return %arg0, %c0_i32, %c0_i32_0 : i32, i32, i32
  }
  func.func @transform_2(%arg0: i32, %arg1: i32) -> (i32, i32, i32) {
    %c0_i32 = arith.constant 0 : i32
    %c0_i32_0 = arith.constant 0 : i32
    %c0_i32_1 = arith.constant 0 : i32
    return %arg0, %c0_i32, %c0_i32_0 : i32, i32, i32
  }
  func.func @transform_3(%arg0: i32, %arg1: i32) -> (i32, i32, i32) {
    %c0_i32 = arith.constant 0 : i32
    %c0_i32_0 = arith.constant 0 : i32
    %c0_i32_1 = arith.constant 0 : i32
    return %arg0, %c0_i32, %c0_i32_0 : i32, i32, i32
  }
  func.func @transform_4(%arg0: i32, %arg1: i32) -> (i32, i32) {
    %c0_i32 = arith.constant 0 : i32
    %c0_i32_0 = arith.constant 0 : i32
    %c0_i32_1 = arith.constant 0 : i32
    return %c0_i32, %c0_i32_0 : i32, i32
  }
  func.func @transform_5(%arg0: i32, %arg1: i32) -> (i32, i32) {
    %c0_i32 = arith.constant 0 : i32
    %c0_i32_0 = arith.constant 0 : i32
    %c0_i32_1 = arith.constant 0 : i32
    return %c0_i32, %c0_i32_0 : i32, i32
  }
  func.func @transform_6(%arg0: i32, %arg1: i32) -> (i32, i32) {
    %c0_i32 = arith.constant 0 : i32
    %c0_i32_0 = arith.constant 0 : i32
    %c0_i32_1 = arith.constant 0 : i32
    return %c0_i32, %c0_i32_0 : i32, i32
  }
  func.func @transform_7(%arg0: i32, %arg1: i32) -> (i32, i32) {
    %c0_i32 = arith.constant 0 : i32
    %c0_i32_0 = arith.constant 0 : i32
    %c0_i32_1 = arith.constant 0 : i32
    return %c0_i32, %c0_i32_0 : i32, i32
  }
  func.func @transform_8(%arg0: i32, %arg1: i32) -> (i32, i32, i32) {
    %c1_i32 = arith.constant 1 : i32
    %0 = arith.minsi %arg1, %c1_i32 : i32
    %c0_i32 = arith.constant 0 : i32
    %c0_i32_0 = arith.constant 0 : i32
    %c0_i32_1 = arith.constant 0 : i32
    return %0, %c0_i32, %c0_i32_0 : i32, i32, i32
  }
  func.func @transform_9(%arg0: i32, %arg1: i32) -> (i32, i32, i32) {
    %c1_i32 = arith.constant 1 : i32
    %0 = arith.minsi %arg1, %c1_i32 : i32
    %c0_i32 = arith.constant 0 : i32
    %c0_i32_0 = arith.constant 0 : i32
    %c0_i32_1 = arith.constant 0 : i32
    return %0, %c0_i32, %c0_i32_0 : i32, i32, i32
  }
  func.func @transform_10(%arg0: i32, %arg1: i32) -> (i32, i32, i32) {
    %c1_i32 = arith.constant 1 : i32
    %0 = arith.minsi %arg1, %c1_i32 : i32
    %c0_i32 = arith.constant 0 : i32
    %c0_i32_0 = arith.constant 0 : i32
    %c0_i32_1 = arith.constant 0 : i32
    return %0, %c0_i32, %c0_i32_0 : i32, i32, i32
  }
  func.func @transform_11(%arg0: i32, %arg1: i32) -> (i32, i32) {
    %c2_i32 = arith.constant 2 : i32
    %0 = arith.subi %arg1, %c2_i32 : i32
    %c0_i32 = arith.constant 0 : i32
    %1 = arith.maxsi %0, %c0_i32 : i32
    %c0_i32_0 = arith.constant 0 : i32
    %c0_i32_1 = arith.constant 0 : i32
    return %c0_i32_0, %1 : i32, i32
  }
  func.func @transform_12(%arg0: i32, %arg1: i32) -> (i32, i32) {
    %c2_i32 = arith.constant 2 : i32
    %0 = arith.subi %arg1, %c2_i32 : i32
    %c0_i32 = arith.constant 0 : i32
    %1 = arith.maxsi %0, %c0_i32 : i32
    %c0_i32_0 = arith.constant 0 : i32
    %c0_i32_1 = arith.constant 0 : i32
    return %c0_i32_0, %1 : i32, i32
  }
  func.func @transform_13(%arg0: i32, %arg1: i32) -> (i32, i32) {
    %c2_i32 = arith.constant 2 : i32
    %0 = arith.subi %arg1, %c2_i32 : i32
    %c0_i32 = arith.constant 0 : i32
    %1 = arith.maxsi %0, %c0_i32 : i32
    %c0_i32_0 = arith.constant 0 : i32
    %c0_i32_1 = arith.constant 0 : i32
    return %1, %c0_i32_0 : i32, i32
  }
  func.func @transform_14(%arg0: i32, %arg1: i32) -> (i32, i32) {
    %c0_i32 = arith.constant 0 : i32
    %c0_i32_0 = arith.constant 0 : i32
    %c0_i32_1 = arith.constant 0 : i32
    return %c0_i32, %c0_i32_0 : i32, i32
  }
  func.func @transform_15(%arg0: i32, %arg1: i32) -> (i32, i32, i32) {
    %c0_i32 = arith.constant 0 : i32
    %c0_i32_0 = arith.constant 0 : i32
    %c0_i32_1 = arith.constant 0 : i32
    return %arg0, %c0_i32, %c0_i32_0 : i32, i32, i32
  }
}

</mosaic_0001>

<bundles_post_ra>
// kernel: tpu_custom_call.1
= control target key start
LH: loop header
LB: loop body
LE: loop exit
PB: predicated region body
PF: predicated region fallthrough
CT: control target
= control target key end

     0   :  { %s4262_s0 = inlined_call_operand.hbm [shape: f32[2,16,256], index: 0, kind: input, shape index: {}]   ;;  %s4263_s1 = inlined_call_operand.hbm [shape: f32[2,1,256], index: 1, kind: input, shape index: {}]   ;;  %s4264_s2 = inlined_call_operand.hbm [shape: f32[2,1,256], index: 2, kind: input, shape index: {}]   ;;  %s4265_s3 = inlined_call_operand.hbm [shape: f32[2,1,256], index: 3, kind: input, shape index: {}]   ;;  %s4266_s4 = inlined_call_operand.hbm [shape: f32[16,128], index: 4, kind: input, shape index: {}]   ;;  %s4267_s5 = inlined_call_operand.hbm [shape: f32[16,128], index: 5, kind: input, shape index: {}]   ;;  %s4268_s6 = inlined_call_operand.hbm [shape: f32[1,128], index: 6, kind: input, shape index: {}]   ;;  %s4269_s7 = inlined_call_operand.hbm [shape: f32[1,128], index: 7, kind: input, shape index: {}]   ;;  %s4270_s8 = inlined_call_operand.hbm [shape: f32[2,256,384], index: 8, kind: input, shape index: {}]   ;;  %s4271_s9 = inlined_call_operand.vmem [shape: f32[2,1,384], index: 9, kind: input, shape index: {}]   ;;  %s4272_s10 = inlined_call_operand.hbm [shape: f32[2,128,256], index: 10, kind: input, shape index: {}]   ;;  %s4273_s11 = inlined_call_operand.hbm [shape: f32[256,1024], index: 11, kind: input, shape index: {}]   ;;  %s4274_s12 = inlined_call_operand.vmem [shape: f32[1,1024], index: 12, kind: input, shape index: {}]   ;;  %s4275_s13 = inlined_call_operand.hbm [shape: f32[1024,256], index: 13, kind: input, shape index: {}]   ;;  %s4276_s14 = inlined_call_operand.vmem [shape: f32[1,256], index: 14, kind: input, shape index: {}]   ;;  %s4277_s15 = inlined_call_operand.hbm [shape: f32[2,16,256], index: 15, kind: output, shape index: {}]  }
   0x1   :  { %4308 = sst [smem:[#allocation48_spill]] %s4262_s0 }
   0x2   :  { %4309 = sst [smem:[#allocation49_spill]] %s4263_s1 }
   0x3   :  { %4310 = sst [smem:[#allocation50_spill]] %s4264_s2 }
   0x4   :  { %4311 = sst [smem:[#allocation51_spill]] %s4265_s3 }
   0x5   :  { %4312 = sst [smem:[#allocation52_spill]] %s4266_s4 }
   0x6   :  { %4313 = sst [smem:[#allocation53_spill]] %s4267_s5 }
   0x7   :  { %4314 = sst [smem:[#allocation54_spill]] %s4268_s6 }
   0x8   :  { %4315 = sst [smem:[#allocation55_spill]] %s4269_s7 }
   0x9   :  { %4316 = sst [smem:[#allocation56_spill]] %s4270_s8 }
   0xa   :  { %4317 = sst [smem:[#allocation57_spill]] %s4271_s9 }
   0xb   :  { %4318 = sst [smem:[#allocation58_spill]] %s4272_s10 }
   0xc   :  { %4319 = sst [smem:[#allocation59_spill]] %s4273_s11 }
   0xd   :  { %4320 = sst [smem:[#allocation60_spill]] %s4274_s12 }
   0xe   :  { %4321 = sst [smem:[#allocation61_spill]] %s4275_s13 }
   0xf   :  { %4322 = sst [smem:[#allocation62_spill]] %s4276_s14 }
  0x10   :  { %4323 = sst [smem:[#allocation63_spill]] %s4277_s15 }
  0x11   :  { %20 = vsyncpa [#allocation5], 0 }
  0x12   :  { %22 = vsyncpa [#allocation5 + $0x1], 0 }
  0x13   :  { %23 = vsyncpa [#allocation8], 0 }
  0x14   :  { %25 = vsyncpa [#allocation8 + $0x1], 0 }
  0x15   :  { %26 = vsyncpa [#allocation11], 0 }
  0x16   :  { %28 = vsyncpa [#allocation11 + $0x1], 0 }
  0x17   :  { %29 = vsyncpa [#allocation14], 0 }
  0x18   :  { %30 = vsyncpa [#allocation17], 0 }
  0x19   :  { %31 = vsyncpa [#allocation6], 0 }
  0x1a   :  { %33 = vsyncpa [#allocation6 + $0x1], 0  ;;  %s3385_s18 = smov 0   ;;  %s3387_s19 = smov 0  }
  0x1b   :  { %s3389_s20 = smov 0   ;;  %s3391_s21 = smov 0  }
  0x1c   :  { %s3393_s22 = smov 0   ;;  %s3395_s23 = smov 0  }
  0x1d   :  { %s3397_s24 = smov 0   ;;  %s3399_s25 = smov 0  }
  0x1e   :  { %s3401_s26 = smov 0   ;;  %s3403_s27 = smov 0  }
  0x1f   :  { %s3405_s28 = smov 0   ;;  %s3407_s29 = smov 0  }
  0x20   :  { %s3409_s30 = smov 0   ;;  %s3411_s16 = smov 0  }
  0x21 LB: > { %4324 = sst [smem:[#allocation34_spill]] %s3226_s18  ;;  %s3456_s17 = sadd.s32 4294967295, %s3278_s16   ;;  %s3278_s16 = sphi %s3411_s16, %s39_s16   ;;  %s3274_s30 = sphi %s3409_s30, %s4427_s30   ;;  %s3270_s29 = sphi %s3407_s29, %s4426_s29   ;;  %s3266_s28 = sphi %s3405_s28, %s4425_s28   ;;  %s3262_s27 = sphi %s3403_s27, %s4424_s27   ;;  %s3258_s26 = sphi %s3401_s26, %s4423_s26   ;;  %s3254_s25 = sphi %s3399_s25, %s4422_s25   ;;  %s3250_s24 = sphi %s3397_s24, %s4414_s24   ;;  %s3246_s23 = sphi %s3395_s23, %s4421_s23   ;;  %s3242_s22 = sphi %s3393_s22, %s4420_s22   ;;  %s3238_s21 = sphi %s3391_s21, %s4419_s21   ;;  %s3234_s20 = sphi %s3389_s20, %s4418_s20   ;;  %s3230_s19 = sphi %s3387_s19, %s4412_s19   ;;  %s3226_s18 = sphi %s3385_s18, %s4411_s18  }
  0x22   : > { %4325 = sst [smem:[#allocation35_spill]] %s3230_s19  ;;  %p2393_p0 = scmp.ge.s32.totalorder %s3278_s16, 1 }
  0x23   : > { %4326 = sst [smem:[#allocation36_spill]] %s3234_s20  ;;  %p4287_p1 = scmp.eq.s32.totalorder %s3456_s17, 0 }
  0x24   : > { %4327 = sst [smem:[#allocation37_spill]] %s3250_s24  ;;  %p477_p2 = scmp.lt.s32.totalorder %s3278_s16, 13 }
  0x25   : > { %4328 = sst [smem:[#allocation38_spill]] %s3254_s25 }
  0x26   : > { %4329 = sst [smem:[#allocation39_spill]] %s3262_s27  ;;  %p3461_p3 = pnand %p2393_p0, %p477_p2 }
  0x27   : > { %4330 = sst [smem:[#allocation40_spill]] %s3266_s28  ;;  %s3280_s28 = smov [#allocation12]  }
  0x28   : > { %s4331_s15 = scalar_select %p3461_p3, 1, 0 }
  0x29   : > { %s489_s14 = sshll.u32 %s3280_s28, 4  ;;  %p2562_p4 = pneg %p3461_p3  ;;  %s490_s14 = int_to_ptr.vmem [resolvable:$true] %s489_s14 }
  0x2a   : > { %4332 = sst [smem:[#allocation41_spill]] %s4331_s15  ;;  %s2781_s9 = scalar_lea.vmem %s490_s14, 256 }
  0x2b   : > { %p3469_p5 = pnand %p2562_p4, %p4287_p1  ;;  %p2782_p7 = scmp.ne.s32.totalorder %s490_s14, %s2781_s9 }
  0x2c   : > { %p2789_p10 = scmp.lt.s32.totalorder %s490_s14, %s490_s14  ;;  %p2790_p11 = scmp.lt.s32.totalorder %s2781_s9, %s2781_s9 }
  0x2d   : > { %p4286_p6 = pneg %p3469_p5 }
  0x2e   : > { %p2791_p12 = por %p2790_p11, %p2789_p10 }
  0x2f   : > { %p2784_p8 = pnand %p2782_p7, %p4286_p6 }
  0x31   : > { %p2785_p9 = pneg %p2784_p8 }
  0x33   : > { %p2792_p13 = pnand %p2791_p12, %p2785_p9 }
  0x35   : > { %2795 = shalt.err (!%p2792_p13)
}
  0x36   : > { %s4285_s28 = smov 128   ;;  %s4288_s9 = smov 8  }
  0x37   : > { %s4334_s4 = sld [smem:[#allocation52_spill]]  ;;  %s2386_s13 = sadd.s32 4294967294, %s3278_s16  }
  0x38   : > { %s4284_s11 = sadd.s32 1, %s3270_s29  ;;  %s51_s18 = sadd.s32 1, %s3274_s30 }
  0x39   : > { %p3491_p0 = scmp.ge.s32.totalorder %s4284_s11, 6  ;;  %s58_s20 = sadd.s32 1, %s3258_s26 }
  0x3a   : > { %p65_p2 = scmp.ne.s32.totalorder %s3258_s26, %s3254_s25  ;;  %p4283_p4 = scmp.eq.s32.totalorder %s3278_s16, 0 }
  0x3b   : > { %s4429_s18 = smov (!%p3491_p0, %s51_s18), %s3274_s30  ;;  %p71_p8 = scmp.ne.s32.totalorder %s3254_s25, %s3250_s24 }
  0x3c   : > { %p3504_p7 = por %p4283_p4, %p65_p2  ;;  %p53_p9 = scmp.ge.s32.totalorder %s4429_s18, 2 }
  0x3d   : > { %2565 = dma.hbm_to_vmem [thread:$0]  (!%p3469_p5), %s4334_s4, 256, %s490_s14, [#allocation11], %s4285_s28, %s4285_s28, %s4288_s9  }
  0x3e   : > { %p464_p10 = scmp.eq.s32.totalorder %s3456_s17, 11  ;;  %p3513_p11 = por %p4287_p1, %p71_p8 }
  0x3f   : > { %p470_p12 = scmp.eq.s32.totalorder %s2386_s13, 11  ;;  %s4431_s18 = smov (%p53_p9, %s4429_s18), 0 }
  0x40   : > { %s4337_s15 = scalar_select %p3513_p11, 1, 0 }
  0x41   : > { %4339 = sst [smem:[#allocation43_spill]] %s4431_s18  ;;  %p3519_p13 = por %p464_p10, %p65_p2 }
  0x42   : > { %4338 = sst [smem:[#allocation42_spill]] %s4337_s15  ;;  %p3523_p4 = por %p470_p12, %p71_p8 }
  0x43   : > { %s4340_s27 = scalar_select %p3519_p13, 1, 0 }
  0x44   : > { %s4342_s11 = scalar_select %p3523_p4, 1, 0 }
  0x45   : > { %4341 = sst [smem:[#allocation44_spill]] %s4340_s27  ;;  %s55_s28 = ssub.s32 %s3274_s30, %s4431_s18 }
  0x46   : > { %4343 = sst [smem:[#allocation45_spill]] %s4342_s11  ;;  %p4296_p6 = scmp.lt.s32.totalorder %s3278_s16, 12 }
  0x47   : > { %p56_p1 = scmp.eq.s32.totalorder %s55_s28, 0  ;;  %s3531_s9 = sand.u32 1, %s3278_s16  }
  0x48   : > { %s543_s4 = sand.u32 1, %s3258_s26   ;;  %s2455_s15 = sshll.u32 %s3274_s30, 9 }
  0x49   : > { %s3535_s24 = scalar_select %p56_p1, %s3258_s26, %s58_s20  }
  0x4a   : > { %s2399_s13 = sshll.u32 %s543_s4, 5  ;;  %s4345_s0 = sld [smem:[#allocation48_spill]] }
  0x4b   : > { %4344 = sst [smem:[#allocation46_spill]] %s3535_s24  ;;  %s545_s7 = scalar_lea.vmem [#allocation4], %s2399_s13 }
  0x4c   : > { %s552_s6 = sshll.u32 %s545_s7, 4  ;;  %p3547_p2 = pnand %p4296_p6, %p3504_p7  ;;  %s553_s6 = int_to_ptr.vmem [resolvable:$true] %s552_s6 }
  0x4d   : > { %s3552_s20 = scalar_lea.sflag [#allocation5], %s3531_s9  ;;  %s2809_s28 = scalar_lea.vmem %s553_s6, 512 }
  0x4e   : > { %p4302_p1 = pneg %p3547_p2  ;;  %p2810_p8 = scmp.ne.s32.totalorder %s553_s6, %s2809_s28 }
  0x4f   : > { %s3283_s7 = smov [#allocation4]  }
  0x50   : > { %s551_s27 = scalar_lea.hbm %s4345_s0, %s2455_s15  ;;  %p2812_p9 = pnand %p2810_p8, %p4302_p1 }
  0x51   : > { %s2814_s10 = sshll.u32 %s3283_s7, 4  ;;  %s2815_s10 = int_to_ptr.vmem [resolvable:$false] %s2814_s10 }
  0x52   : > { %p2813_p10 = pneg %p2812_p9  ;;  %s2816_s25 = scalar_lea.vmem %s2815_s10, 1024 }
  0x53   : > { %p2817_p7 = scmp.lt.s32.totalorder %s553_s6, %s2815_s10  ;;  %p2818_p12 = scmp.lt.s32.totalorder %s2816_s25, %s2809_s28 }
  0x55   : > { %p2819_p6 = por %p2818_p12, %p2817_p7 }
  0x57   : > { %p2820_p4 = pnand %p2819_p6, %p2813_p10 }
  0x59   : > { %2823 = shalt.err (!%p2820_p4)
}
  0x5a   : > { %s4298_s14 = smov 256   ;;  %s4300_s15 = smov 16  }
  0x5b   : > { %2578 = dma.hbm_to_vmem [thread:$0]  (!%p3547_p2), %s551_s27, 512, %s553_s6, %s3552_s20, %s4298_s14, %s4298_s14, %s4300_s15  }
  0x5c   : > { %s3567_s13 = sshll.u32 %s543_s4, 1  ;;  %s3570_s28 = sshll.u32 %s3274_s30, 5 }
  0x5d   : > { %s4347_s1 = sld [smem:[#allocation49_spill]]  ;;  %s566_s0 = scalar_lea.vmem [#allocation7], %s3567_s13 }
  0x5e   : > { %s574_s24 = sshll.u32 %s566_s0, 4  ;;  %s3578_s11 = scalar_lea.sflag [#allocation8], %s3531_s9  ;;  %s575_s24 = int_to_ptr.vmem [resolvable:$true] %s574_s24 }
  0x5f   : > { %s2837_s8 = scalar_lea.vmem %s575_s24, 32  ;;  %s3286_s4 = smov [#allocation7]  }
  0x60   : > { %p2838_p6 = scmp.ne.s32.totalorder %s575_s24, %s2837_s8  ;;  %s2842_s6 = sshll.u32 %s3286_s4, 4  ;;  %s2843_s6 = int_to_ptr.vmem [resolvable:$false] %s2842_s6 }
  0x61   : > { %s2844_s27 = scalar_lea.vmem %s2843_s6, 64  ;;  %p2845_p9 = scmp.lt.s32.totalorder %s575_s24, %s2843_s6 }
  0x62   : > { %p2840_p4 = pnand %p2838_p6, %p4302_p1  ;;  %p2846_p10 = scmp.lt.s32.totalorder %s2844_s27, %s2837_s8 }
  0x63   : > { %s572_s25 = scalar_lea.hbm %s4347_s1, %s3570_s28 }
  0x64   : > { %p2841_p8 = pneg %p2840_p4  ;;  %p2847_p7 = por %p2846_p10, %p2845_p9 }
  0x66   : > { %p2848_p12 = pnand %p2847_p7, %p2841_p8 }
  0x68   : > { %2851 = shalt.err (!%p2848_p12)
}
  0x69   : > { %2581 = dma.hbm_to_vmem [thread:$0]  (!%p3547_p2), %s572_s25, 32, %s575_s24, %s3578_s11  }
  0x6a   : > { %s3287_s0 = smov [#allocation13]   ;;  %s4348_s2 = sld [smem:[#allocation50_spill]] }
  0x6b   : > { %s502_s7 = sshll.u32 %s3287_s0, 4  ;;  %p4349_p4 = pneg %p3469_p5  ;;  %s503_s7 = int_to_ptr.vmem [resolvable:$true] %s502_s7 }
  0x6c   : > { %s2863_s15 = scalar_lea.vmem %s503_s7, 256  ;;  %p2871_p10 = scmp.lt.s32.totalorder %s503_s7, %s503_s7 }
  0x6d   : > { %p2864_p6 = scmp.ne.s32.totalorder %s503_s7, %s2863_s15  ;;  %p2872_p7 = scmp.lt.s32.totalorder %s2863_s15, %s2863_s15 }
  0x6f   : > { %p2866_p9 = pnand %p2864_p6, %p4349_p4  ;;  %p2873_p12 = por %p2872_p7, %p2871_p10 }
  0x70   : > { %s591_s4 = scalar_lea.hbm %s4348_s2, %s3570_s28 }
  0x71   : > { %p2867_p8 = pneg %p2866_p9 }
  0x73   : > { %p2874_p1 = pnand %p2873_p12, %p2867_p8 }
  0x75   : > { %2877 = shalt.err (!%p2874_p1)
}
  0x76   : > { %s4350_s8 = smov 8   ;;  %s4351_s24 = smov 128  }
  0x77   : > { %s4352_s5 = sld [smem:[#allocation53_spill]]  ;;  %s585_s14 = scalar_lea.vmem [#allocation9], %s3567_s13 }
  0x78   : > { %s593_s27 = sshll.u32 %s585_s14, 4  ;;  %p4353_p4 = pneg %p3547_p2  ;;  %s594_s27 = int_to_ptr.vmem [resolvable:$true] %s593_s27 }
  0x79   : > { %s2891_s0 = scalar_lea.vmem %s594_s27, 32  ;;  %s3288_s15 = smov [#allocation9]  }
  0x7a   : > { %p2892_p6 = scmp.ne.s32.totalorder %s594_s27, %s2891_s0  ;;  %s2896_s10 = sshll.u32 %s3288_s15, 4  ;;  %s2897_s10 = int_to_ptr.vmem [resolvable:$false] %s2896_s10 }
  0x7b   : > { %s2898_s1 = scalar_lea.vmem %s2897_s10, 64  ;;  %p2899_p8 = scmp.lt.s32.totalorder %s594_s27, %s2897_s10 }
  0x7c   : > { %p2894_p9 = pnand %p2892_p6, %p4353_p4  ;;  %p2900_p10 = scmp.lt.s32.totalorder %s2898_s1, %s2891_s0 }
  0x7d   : > { %2568 = dma.hbm_to_vmem [thread:$0]  (!%p3469_p5), %s4352_s5, 256, %s503_s7, [#allocation14], %s4351_s24, %s4351_s24, %s4350_s8  }
  0x7e   : > { %p2895_p1 = pneg %p2894_p9  ;;  %p2901_p7 = por %p2900_p10, %p2899_p8 }
  0x80   : > { %p2902_p12 = pnand %p2901_p7, %p2895_p1 }
  0x82   : > { %2905 = shalt.err (!%p2902_p12)
}
  0x83   : > { %2584 = dma.hbm_to_vmem [thread:$0]  (!%p3547_p2), %s591_s4, 32, %s594_s27, %s3578_s11  }
  0x84   : > { %s4354_s3 = sld [smem:[#allocation51_spill]]  ;;  %s604_s25 = scalar_lea.vmem [#allocation10], %s3567_s13 }
  0x85   : > { %s612_s6 = sshll.u32 %s604_s25, 4  ;;  %s4303_s14 = scalar_lea.sflag [#allocation11], %s3531_s9  ;;  %s613_s6 = int_to_ptr.vmem [resolvable:$true] %s612_s6 }
  0x86   : > { %s2919_s1 = scalar_lea.vmem %s613_s6, 32  ;;  %s3289_s0 = smov [#allocation10]  }
  0x87   : > { %p2920_p6 = scmp.ne.s32.totalorder %s613_s6, %s2919_s1  ;;  %s2924_s15 = sshll.u32 %s3289_s0, 4  ;;  %s2925_s15 = int_to_ptr.vmem [resolvable:$false] %s2924_s15 }
  0x88   : > { %s2926_s10 = scalar_lea.vmem %s2925_s15, 64  ;;  %p2927_p8 = scmp.lt.s32.totalorder %s613_s6, %s2925_s15 }
  0x89   : > { %p2922_p9 = pnand %p2920_p6, %p4353_p4  ;;  %p2928_p10 = scmp.lt.s32.totalorder %s2926_s10, %s2919_s1 }
  0x8a   : > { %s610_s24 = scalar_lea.hbm %s4354_s3, %s3570_s28 }
  0x8b   : > { %p2923_p1 = pneg %p2922_p9  ;;  %p2929_p7 = por %p2928_p10, %p2927_p8 }
  0x8d   : > { %p2930_p12 = pnand %p2929_p7, %p2923_p1 }
  0x8f   : > { %2933 = shalt.err (!%p2930_p12)
}
  0x90   : > { %2587 = dma.hbm_to_vmem [thread:$0]  (!%p3547_p2), %s610_s24, 32, %s613_s6, %s4303_s14  }
  0x91   : > { %p243_p6 = scmp.lt.s32.totalorder %s3270_s29, 1  ;;  %s4355_s13 = sadd.s32 1, %s3270_s29 }
  0x92   : > { %s4433_s13 = smov (%p3491_p0, %s4355_s13), 0  ;;  %s250_s28 = sadd.s32 1, %s3246_s23 }
  0x93   : > { %4356 = sst [smem:[#allocation47_spill]] %s4433_s13  ;;  %p245_p4 = scmp.lt.s32.totalorder %s4433_s13, 1 }
  0x94   : > { %s3629_s18 = scalar_select %p243_p6, %s3270_s29, 1 }
  0x95   : > { %p257_p9 = scmp.ne.s32.totalorder %s3246_s23, %s3242_s22  ;;  %p263_p1 = scmp.ne.s32.totalorder %s3242_s22, %s3238_s21 }
  0x96   : > { %s246_s4 = scalar_select %p245_p4, %s4433_s13, 1 }
  0x97   : > { %p4357_p8 = scmp.eq.s32.totalorder %s3278_s16, 0  ;;  %p4358_p10 = scmp.eq.s32.totalorder %s3456_s17, 0 }
  0x98   : > { %s247_s19 = ssub.s32 %s3629_s18, %s246_s4  ;;  %s4304_s7 = sand.u32 1, %s3246_s23  }
  0x99   : > { %p259_p2 = por %p257_p9, %p4357_p8  ;;  %p3642_p7 = por %p263_p1, %p4358_p10 }
  0x9a   : > { %p248_p0 = scmp.eq.s32.totalorder %s247_s19, 0  ;;  %s2524_s8 = smul.u32 768, %s4304_s7 }
  0x9b   : > { %s2525_s24 = smul.u32 12288, %s3629_s18  ;;  %p4360_p12 = scmp.lt.s32.totalorder %s3278_s16, 12 }
  0x9c   : > { %s3658_s21 = scalar_select %p248_p0, %s3246_s23, %s250_s28  }
  0x9d   : > { %p3653_p6 = pnand %p4360_p12, %p259_p2  ;;  %s4362_s0 = sld [smem:[#allocation56_spill]] }
  0x9e   : > { %s623_s10 = scalar_lea.vmem [#allocation18], %s2524_s8  ;;  %s3290_s14 = smov [#allocation18]  }
  0x9f   : > { %s632_s4 = sshll.u32 %s623_s10, 4  ;;  %p4305_p4 = pneg %p3653_p6  ;;  %s633_s4 = int_to_ptr.vmem [resolvable:$true] %s632_s4 }
  0xa0   : > { %s2947_s19 = scalar_lea.vmem %s633_s4, 12288  ;;  %s2952_s7 = sshll.u32 %s3290_s14, 4  ;;  %s2953_s7 = int_to_ptr.vmem [resolvable:$false] %s2952_s7 }
  0xa1   : > { %p2948_p9 = scmp.ne.s32.totalorder %s633_s4, %s2947_s19  ;;  %s2954_s28 = scalar_lea.vmem %s2953_s7, 24576 }
  0xa2   : > { %p2955_p2 = scmp.lt.s32.totalorder %s633_s4, %s2953_s7  ;;  %p2956_p10 = scmp.lt.s32.totalorder %s2954_s28, %s2947_s19 }
  0xa3   : > { %s631_s15 = scalar_lea.hbm %s4362_s0, %s2525_s24  ;;  %p2950_p1 = pnand %p2948_p9, %p4305_p4 }
  0xa4   : > { %p2957_p0 = por %p2956_p10, %p2955_p2 }
  0xa5   : > { %p2951_p8 = pneg %p2950_p1 }
  0xa7   : > { %p2958_p12 = pnand %p2957_p0, %p2951_p8 }
  0xa9   : > { %2961 = shalt.err (!%p2958_p12)
}
  0xaa   : > { %s3291_s8 = smov 384   ;;  %s3292_s24 = smov 24  }
  0xab   : > { %2590 = dma.hbm_to_vmem [thread:$0]  (!%p3653_p6), %s631_s15, 12288, %s633_s4, %s3552_s20, %s3291_s8, %s3291_s8, %s3292_s24  }
  0xac   : > { %s3293_s6 = smov [#allocation15]   ;;  %s3294_s0 = smov [#allocation16]  }
  0xad   : > { %s516_s1 = sshll.u32 %s3293_s6, 4  ;;  %s527_s10 = sshll.u32 %s3294_s0, 4  ;;  %s517_s1 = int_to_ptr.vmem [resolvable:$true] %s516_s1  ;;  %s528_s10 = int_to_ptr.vmem [resolvable:$true] %s527_s10 }
  0xae   : > { %s2973_s14 = scalar_lea.vmem %s517_s1, 16  ;;  %p4363_p1 = pneg %p3469_p5 }
  0xaf   : > { %p2974_p9 = scmp.ne.s32.totalorder %s517_s1, %s2973_s14  ;;  %s2980_s7 = scalar_lea.vmem %s517_s1, 32 }
  0xb0   : > { %p2981_p8 = scmp.lt.s32.totalorder %s517_s1, %s517_s1  ;;  %p2982_p10 = scmp.lt.s32.totalorder %s2980_s7, %s2973_s14 }
  0xb1   : > { %p2976_p4 = pnand %p2974_p9, %p4363_p1 }
  0xb2   : > { %p2983_p0 = por %p2982_p10, %p2981_p8 }
  0xb3   : > { %p2977_p2 = pneg %p2976_p4 }
  0xb5   : > { %p2984_p12 = pnand %p2983_p0, %p2977_p2 }
  0xb7   : > { %2987 = shalt.err (!%p2984_p12)
}
  0xb8   : > { %s4364_s19 = sld [smem:[#allocation54_spill]]  ;;  %s4365_s28 = sand.u32 1, %s3246_s23  }
  0xb9   : > { %s2412_s8 = sshll.u32 %s4365_s28, 8  ;;  %s2999_s24 = scalar_lea.vmem %s528_s10, 16 }
  0xba   : > { %p3000_p9 = scmp.ne.s32.totalorder %s528_s10, %s2999_s24  ;;  %p4366_p4 = pmov %p4363_p1 }
  0xbb   : > { %s3006_s6 = scalar_lea.vmem %s528_s10, 32  ;;  %p3007_p2 = scmp.lt.s32.totalorder %s528_s10, %s528_s10 }
  0xbc   : > { %p3002_p1 = pnand %p3000_p9, %p4366_p4  ;;  %p3008_p8 = scmp.lt.s32.totalorder %s3006_s6, %s2999_s24 }
  0xbe   : > { %2571 = dma.hbm_to_vmem [thread:$0]  (!%p3469_p5), %s4364_s19, 16, %s517_s1, [#allocation14]  }
  0xbf   : > { %p3003_p13 = pneg %p3002_p1  ;;  %p3009_p10 = por %p3008_p8, %p3007_p2 }
  0xc1   : > { %p3010_p0 = pnand %p3009_p10, %p3003_p13 }
  0xc3   : > { %3013 = shalt.err (!%p3010_p0)
}
  0xc4   : > { %s4367_s1 = sld [smem:[#allocation55_spill]]  ;;  %s2459_s7 = sshll.u32 %s3629_s18, 12 }
  0xc5   : > { %s4368_s19 = sld [smem:[#allocation58_spill]]  ;;  %s657_s2 = scalar_lea.vmem [#allocation19], %s2412_s8 }
  0xc6   : > { %s666_s3 = sshll.u32 %s657_s2, 4  ;;  %p4369_p13 = pneg %p3653_p6  ;;  %s667_s3 = int_to_ptr.vmem [resolvable:$true] %s666_s3 }
  0xc7   : > { %s3027_s24 = scalar_lea.vmem %s667_s3, 4096  ;;  %s3295_s12 = smov [#allocation19]  }
  0xc8   : > { %p3028_p12 = scmp.ne.s32.totalorder %s667_s3, %s3027_s24  ;;  %s3032_s6 = sshll.u32 %s3295_s12, 4  ;;  %s3033_s6 = int_to_ptr.vmem [resolvable:$false] %s3032_s6 }
  0xc9   : > { %s3034_s0 = scalar_lea.vmem %s3033_s6, 8192  ;;  %p3035_p1 = scmp.lt.s32.totalorder %s667_s3, %s3033_s6 }
  0xca   : > { %2574 = dma.hbm_to_vmem [thread:$0]  (!%p3469_p5), %s4367_s1, 16, %s528_s10, [#allocation17]  }
  0xcb   : > { %s665_s28 = scalar_lea.hbm %s4368_s19, %s2459_s7  ;;  %p3030_p9 = pnand %p3028_p12, %p4369_p13 }
  0xcc   : > { %p3036_p5 = scmp.lt.s32.totalorder %s3034_s0, %s3027_s24 }
  0xcd   : > { %p3031_p4 = pneg %p3030_p9 }
  0xce   : > { %p3037_p2 = por %p3036_p5, %p3035_p1 }
  0xd0   : > { %p3038_p8 = pnand %p3037_p2, %p3031_p4 }
  0xd2   : > { %3041 = shalt.err (!%p3038_p8)
}
  0xd3   : > { %s4370_s18 = smov 16   ;;  %s4371_s2 = smov 256  }
  0xd4   : > { %s4372_s10 = sld [smem:[#allocation36_spill]]  ;;  %s2387_s1 = sadd.s32 4294967294, %s3270_s29 }
  0xd5   : > { %s4373_s8 = sld [smem:[#allocation35_spill]]  ;;  %p334_p10 = scmp.gt.s32.totalorder %s2387_s1, 0 }
  0xd6   : > { %s4374_s14 = sld [smem:[#allocation34_spill]]  ;;  %s2388_s7 = sadd.s32 4294967294, %s4433_s13 }
  0xd7   : > { %2593 = dma.hbm_to_vmem [thread:$0]  (!%p3653_p6), %s665_s28, 4096, %s667_s3, %s3578_s11, %s4371_s2, %s4371_s2, %s4370_s18  }
  0xd8   : > { %p337_p0 = scmp.gt.s32.totalorder %s2388_s7, 0  ;;  %s4435_s1 = smov (!%p334_p10, %s2387_s1), 0 }
  0xd9   : > { %p4375_p4 = scmp.eq.s32.totalorder %s3278_s16, 0  ;;  %p4376_p1 = scmp.eq.s32.totalorder %s3456_s17, 0 }
  0xda   : > { %s342_s25 = sadd.s32 1, %s4372_s10  ;;  %s4437_s7 = smov (!%p337_p0, %s2388_s7), 0 }
  0xdb   : > { %p349_p12 = scmp.ne.s32.totalorder %s4372_s10, %s4373_s8  ;;  %s339_s15 = ssub.s32 %s4435_s1, %s4437_s7 }
  0xdc   : > { %p355_p13 = scmp.ne.s32.totalorder %s4373_s8, %s4374_s14  ;;  %s678_s4 = sand.u32 1, %s4372_s10  }
  0xdd   : > { %p340_p9 = scmp.eq.s32.totalorder %s339_s15, 0  ;;  %p351_p6 = por %p349_p12, %p4375_p4 }
  0xde   : > { %p3717_p5 = por %p355_p13, %p4376_p1  ;;  %s3721_s11 = sshll.u32 %s678_s4, 9 }
  0xdf   : > { %s4439_s10 = smov (!%p340_p9, %s4372_s10), %s342_s25  ;;  %s2460_s19 = sshll.u32 %s4435_s1, 8 }
  0xe0   : > { %s4378_s12 = sld [smem:[#allocation59_spill]]  ;;  %s680_s0 = scalar_lea.vmem [#allocation20], %s3721_s11 }
  0xe1   : > { %s690_s8 = sshll.u32 %s680_s0, 4  ;;  %p4379_p2 = scmp.lt.s32.totalorder %s3278_s16, 12  ;;  %s691_s8 = int_to_ptr.vmem [resolvable:$true] %s690_s8 }
  0xe2   : > { %s2462_s7 = sshll.u32 %s4435_s1, 13  ;;  %s3055_s25 = scalar_lea.vmem %s691_s8, 8192 }
  0xe3   : > { %p3733_p8 = pnand %p4379_p2, %p351_p6  ;;  %p3056_p0 = scmp.ne.s32.totalorder %s691_s8, %s3055_s25 }
  0xe4   : > { %s3296_s15 = smov [#allocation20]  }
  0xe5   : > { %p3044_p10 = pneg %p3733_p8  ;;  %s3060_s4 = sshll.u32 %s3296_s15, 4  ;;  %s3061_s4 = int_to_ptr.vmem [resolvable:$false] %s3060_s4 }
  0xe6   : > { %s689_s6 = scalar_lea.hbm %s4378_s12, %s2460_s19  ;;  %s3062_s19 = scalar_lea.vmem %s3061_s4, 16384 }
  0xe7   : > { %p3058_p12 = pnand %p3056_p0, %p3044_p10  ;;  %p3063_p9 = scmp.lt.s32.totalorder %s691_s8, %s3061_s4 }
  0xe8   : > { %p3064_p4 = scmp.lt.s32.totalorder %s3062_s19, %s3055_s25 }
  0xe9   : > { %p3059_p13 = pneg %p3058_p12 }
  0xea   : > { %p3065_p6 = por %p3064_p4, %p3063_p9 }
  0xec   : > { %p3066_p1 = pnand %p3065_p6, %p3059_p13 }
  0xee   : > { %3069 = shalt.err (!%p3066_p1)
}
  0xef   : > { %s3297_s28 = smov 1024   ;;  %s4381_s1 = scalar_lea.sflag [#allocation11], %s3531_s9 }
  0xf0   : > { %2596 = dma.hbm_to_vmem [thread:$0]  (!%p3733_p8), %s689_s6, 8192, %s691_s8, %s4381_s1, %s3297_s28, %s4371_s2, %s4370_s18  }
  0xf1   : > { %s4382_s0 = sld [smem:[#allocation61_spill]]  ;;  %s718_s5 = scalar_lea.vmem [#allocation21], %s3721_s11 }
  0xf2   : > { %s729_s4 = sshll.u32 %s718_s5, 4  ;;  %s3298_s19 = smov [#allocation21]   ;;  %s730_s4 = int_to_ptr.vmem [resolvable:$true] %s729_s4 }
  0xf3   : > { %s3083_s25 = scalar_lea.vmem %s730_s4, 8192  ;;  %s3088_s13 = sshll.u32 %s3298_s19, 4  ;;  %s3089_s13 = int_to_ptr.vmem [resolvable:$false] %s3088_s13 }
  0xf4   : > { %p3084_p2 = scmp.ne.s32.totalorder %s730_s4, %s3083_s25  ;;  %s3090_s9 = scalar_lea.vmem %s3089_s13, 16384 }
  0xf5   : > { %p3091_p13 = scmp.lt.s32.totalorder %s730_s4, %s3089_s13  ;;  %p3092_p9 = scmp.lt.s32.totalorder %s3090_s9, %s3083_s25 }
  0xf6   : > { %p3086_p0 = pnand %p3084_p2, %p3044_p10 }
  0xf7   : > { %s728_s15 = scalar_lea.hbm %s4382_s0, %s2462_s7  ;;  %p3093_p4 = por %p3092_p9, %p3091_p13 }
  0xf8   : > { %p3087_p12 = pneg %p3086_p0 }
  0xfa   : > { %p3094_p6 = pnand %p3093_p4, %p3087_p12 }
  0xfc   : > { %3097 = shalt.err (!%p3094_p6)
}
  0xfd   : > { %2599 = dma.hbm_to_vmem [thread:$0]  (!%p3733_p8), %s728_s15, 8192, %s730_s4, %s3552_s20, %s4371_s2, %s4371_s2, %s4370_s18  }
  0xfe   : > { %741 = sbr.rel (%p3461_p3) target bundleno = 2680 (0xa78), region = 80  ;;  %s4384_s11 = sld [smem:[#allocation38_spill]] (!%p3461_p3) }
  0xff   : > { %s743_s8 = sand.u32 (!%p3461_p3), 1, %s3456_s17  }
 0x100   : > { %s3769_s28 = scalar_lea.sflag (!%p3461_p3), [#allocation5], %s743_s8 }
 0x104   : > { %s3766_s7 = sand.u32 1, %s4384_s11  }
 0x105   : > { %s2425_s13 = sshll.u32 %s3766_s7, 5 }
 0x106   : > { %s3773_s14 = scalar_lea.vmem [#allocation4], %s2425_s13 }
 0x107   : > { %3181 = dma.done.wait (%p3513_p11), %s3769_s28, 512  }
 0x108   : > { %3183 = vsyncadd (%p3513_p11), %s3769_s28, 4294966784  ;;  %s3782_s20 = sshll.u32 %s3766_s7, 1  ;;  %s753_s18 = scalar_lea.sflag [#allocation8], %s743_s8 }
 0x109   : > { %3185 = dma.done.wait (%p3513_p11), %s753_s18, 64  }
 0x10a   : > { %3187 = vsyncadd (%p3513_p11), %s753_s18, 4294967232  ;;  %s765_s1 = scalar_lea.vmem [#allocation9], %s3782_s20  ;;  %s771_s24 = scalar_lea.sflag [#allocation11], %s743_s8 }
 0x10b   : > { %3189 = dma.done.wait (%p3513_p11), %s771_s24, 32  }
 0x10c   : > { %3191 = vsyncadd (%p3513_p11), %s771_s24, 4294967264  ;;  %p4386_p3 = scmp.eq.s32.totalorder %s3456_s17, 0 }
 0x10e   : > { %3193 = dma.done.wait (%p4386_p3), [#allocation11], 256   ;;  %p4387_p8 = pmov %p4386_p3 }
 0x10f   : > { %p4388_p10 = pmov %p4386_p3 }
 0x110   : > { %3195 = vsyncadd (%p4387_p8), [#allocation11], 4294967040 }
 0x111   : > { %3197 = dma.done.wait (%p4388_p10), [#allocation14], 272   ;;  %p4389_p1 = pmov %p4386_p3 }
 0x113   : > { %3199 = vsyncadd (%p4389_p1), [#allocation14], 4294967024  ;;  %p4390_p2 = pmov %p4389_p1 }
 0x114   : > { %p4391_p0 = pmov %p4389_p1 }
 0x115   : > { %3201 = dma.done.wait (%p4390_p2), [#allocation17], 16  }
 0x116   : > { %3203 = vsyncadd (%p4391_p0), [#allocation17], 4294967280  ;;  %s797_s0 = sand.u32 1, %s3242_s22  }
 0x117   : > { %s2526_s15 = smul.u32 768, %s797_s0 }
 0x119   : > { %s3808_s4 = scalar_lea.vmem [#allocation18], %s2526_s15 }
 0x11a   : > { %3205 = dma.done.wait (%p3642_p7), %s3769_s28, 12288  }
 0x11b   : > { %3207 = vsyncadd (%p3642_p7), %s3769_s28, 4294955008  ;;  %s2433_s25 = sshll.u32 %s797_s0, 8 }
 0x11c   : > { %s3816_s19 = scalar_lea.vmem [#allocation19], %s2433_s25 }
 0x11d   : > { %3209 = dma.done.wait (%p3642_p7), %s753_s18, 4096  }
 0x11e   : > { %3211 = vsyncadd (%p3642_p7), %s753_s18, 4294963200  ;;  %s4392_s17 = sld [smem:[#allocation35_spill]] }
 0x124   : > { %s815_s9 = sand.u32 1, %s4392_s17  }
 0x125   : > { %s2434_s5 = sshll.u32 %s815_s9, 9 }
 0x126   : > { %s3823_s11 = scalar_lea.vmem [#allocation20], %s2434_s5 }
 0x127   : > { %3213 = dma.done.wait (%p3717_p5), %s771_s24, 8192  }
 0x128   : > { %3215 = vsyncadd (%p3717_p5), %s771_s24, 4294959104  ;;  %s3829_s6 = scalar_lea.vmem [#allocation21], %s2434_s5 }
 0x129   : > { %3217 = dma.done.wait (%p3717_p5), %s3769_s28, 8192  }
 0x12a   : > { %3219 = vsyncadd (%p3717_p5), %s3769_s28, 4294959104  ;;  %s4393_s27 = sld [smem:[#allocation39_spill]]  ;;  %s3853_s2 = scalar_lea.vmem [#allocation22], %s2425_s13 }
 0x12b   : > { %s4394_s17 = sld [smem:[#allocation57_spill]] }
 0x12c   : > { %s4395_s5 = sld [smem:[#allocation60_spill]] }
 0x130   : > { %p923_p11 = scmp.lt.s32.totalorder %s4393_s27, 1  ;;  %s2440_s8 = sadd.s32 4294967294, %s4393_s27 }
 0x131   : > { %p938_p7 = scmp.gt.s32.totalorder %s2440_s8, 0  ;;  %p2442_p5 = scmp.ne.s32.totalorder %s4393_s27, 0 }
 0x132   : > { %s924_s18 = scalar_select %p923_p11, %s4393_s27, 1 }
 0x133   : > { %s4443_s8 = smov (!%p938_p7, %s2440_s8), 0  ;;  %s4396_s13 = scalar_lea.vmem (!%p2442_p5), [#allocation7], %s3782_s20 }
 0x134   : > { %s4441_s18 = smov (!%p923_p11, %s924_s18), 1  ;;  %s2441_s0 = sshll.u32 %s4443_s8, 1 }
 0x135   : > { %s2527_s24 = smul.u32 3, %s4441_s18  ;;  %p941_p12 = scmp.lt.s32.totalorder %s2441_s0, 7 }
 0x136   : > { %955 = sbr.rel (%p2442_p5) target bundleno = 631 (0x277), region = 132 }
 0x137   : > { %s3843_s9 = scalar_lea.vmem %s4394_s17, %s2527_s24  ;;  %s4445_s0 = smov (!%p941_p12, %s2441_s0), 7 }
 0x138   : > { %s943_s12 = scalar_lea.vmem %s4395_s5, %s4445_s0 }
 0x13b   : > { %v956_v0 = vld [vmem:[%s3773_s14] sm:$0xff]  ;;  %v957_v1 = vld [vmem:[%s3773_s14 + $0x8] sm:$0xff]  ;;  %v958_v2 = vld [vmem:[%s3773_s14 + $0x10] sm:$0xff]  ;;  %v3299_v20 = vmov 0.0   ;;  %v996_v25 = vlaneseq }
 0x13c   : > { %v960_v3 = vadd.f32 %v957_v1, %v956_v0  ;;  %v959_v4 = vld [vmem:[%s3773_s14 + $0x18] sm:$0xff]  ;;  %1030 = vst [vmem:[#allocation3] sm:$0xff] %v3299_v20  ;;  %1031 = vst [vmem:[#allocation3 + $0x18] sm:$0xff] %v3299_v20  ;;  %v993_v29 = vld [vmem:[%s765_s1] sm:$0x3] }
 0x13d   : > { %v963_v5 = vadd.f32 %v959_v4, %v958_v2  ;;  %1032 = vst [vmem:[#allocation3 + $0x8] sm:$0xff] %v3299_v20  ;;  %1033 = vst [vmem:[#allocation3 + $0x10] sm:$0xff] %v3299_v20  ;;  %v997_v28 = vshrl.u32 %v996_v25, 7  ;;  %v994_v30 = vadd.f32 1.0, %v993_v29  ;;  %v1010_v33 = vld [vmem:[%s4396_s13] sm:$0x3] }
 0x13e   : > { %961 = vadd.xlane.f32.xlu0 %v960_v3 }
 0x13f   : > { %v998_v31 = vsub.s32 0, %v997_v28  ;;  %v1002_v32 = vsub.s32 1, %v997_v28 }
 0x141   : > { %v999_v34 = vrot.slane %v994_v30, %v998_v31  ;;  %v1003_v35 = vrot.slane %v994_v30, %v1002_v32  ;;  %v1015_v37 = vrot.slane %v1010_v33, %v998_v31  ;;  %v1019_v38 = vrot.slane %v1010_v33, %v1002_v32 }
 0x142   : > { %964 = vadd.xlane.f32.xlu0 %v963_v5 }
 0x1c7   : > { %v962_v6 = vpop.xlane.xlu0 %961 }
 0x1c8   : > { %v967_v7 = vmul.f32 0.00390625, %v962_v6 }
 0x1ca   : > { %v969_v8 = vsub.f32 %v956_v0, %v967_v7  ;;  %v970_v9 = vsub.f32 %v957_v1, %v967_v7 }
 0x1cb   : > { %v965_v10 = vpop.xlane.xlu0 %964 }
 0x1cc   : > { %v968_v11 = vmul.f32 0.00390625, %v965_v10  ;;  %v973_v12 = vmul.f32 %v969_v8, %v969_v8  ;;  %v974_v13 = vmul.f32 %v970_v9, %v970_v9 }
 0x1ce   : > { %v971_v14 = vsub.f32 %v958_v2, %v968_v11  ;;  %v972_v15 = vsub.f32 %v959_v4, %v968_v11  ;;  %v977_v16 = vadd.f32 %v974_v13, %v973_v12 }
 0x1d0   : > { %978 = vadd.xlane.f32.xlu1 %v977_v16  ;;  %v975_v17 = vmul.f32 %v971_v14, %v971_v14  ;;  %v976_v18 = vmul.f32 %v972_v15, %v972_v15 }
 0x1d2   : > { %v980_v19 = vadd.f32 %v976_v18, %v975_v17 }
 0x1d4   : > { %981 = vadd.xlane.f32.xlu1 %v980_v19 }
 0x259   : > { %v979_v21 = vpop.xlane.xlu1 %978 }
 0x25a   : > { %v983_v22 = vmul.f32 0.00390625, %v979_v21 }
 0x25c   : > { %v985_v23 = vadd.f32 1e-06, %v983_v22 }
 0x25d   : > { %v982_v24 = vpop.xlane.xlu1 %981 }
 0x25e   : > { %2742 = vrsqrt.f32 %v985_v23  ;;  %v984_v26 = vmul.f32 0.00390625, %v982_v24 }
 0x260   : > { %v986_v27 = vadd.f32 1e-06, %v984_v26 }
 0x262   : > { %2744 = vrsqrt.f32 %v986_v27 }
 0x26b   : > { %v2743_v36 = vpop.eup %2742 }
 0x26c   : > { %v989_v39 = vmul.f32 %v2743_v36, %v969_v8  ;;  %v990_v40 = vmul.f32 %v2743_v36, %v970_v9 }
 0x26e   : > { %v1006_v41 = vmul.f32 %v999_v34, %v989_v39  ;;  %v1007_v42 = vmul.f32 %v1003_v35, %v990_v40 }
 0x26f   : > { %v2745_v43 = vpop.eup %2744 }
 0x270   : > { %v1022_v44 = vadd.f32 %v1015_v37, %v1006_v41  ;;  %v1023_v45 = vadd.f32 %v1019_v38, %v1007_v42  ;;  %v991_v46 = vmul.f32 %v2745_v43, %v971_v14  ;;  %v992_v47 = vmul.f32 %v2745_v43, %v972_v15 }
 0x272   : > { %1026 = vst [vmem:[#allocation2 + $0x10] sm:$0xff] %v1022_v44  ;;  %1027 = vst [vmem:[#allocation2] sm:$0xff] %v1023_v45  ;;  %v1008_v48 = vmul.f32 %v999_v34, %v991_v46  ;;  %v1009_v49 = vmul.f32 %v1003_v35, %v992_v47 }
 0x274   : > { %v1024_v50 = vadd.f32 %v1015_v37, %v1008_v48  ;;  %v1025_v51 = vadd.f32 %v1019_v38, %v1009_v49 }
 0x276   : > { %1028 = vst [vmem:[#allocation2 + $0x18] sm:$0xff] %v1024_v50  ;;  %1029 = vst [vmem:[#allocation2 + $0x8] sm:$0xff] %v1025_v51 }
 0x277 PF: > { %s4397_s1 = sld [smem:[#allocation39_spill]] }
 0x279   : > { %v3864_v52 = vld [vmem:[#allocation2 + $0x10] sm:$0xff]  ;;  %v3866_v53 = vld [vmem:[#allocation2] sm:$0xff] }
 0x27d   : > { %v3868_v54 = vld [vmem:[#allocation2 + $0x18] sm:$0xff]  ;;  %v3870_v55 = vld [vmem:[#allocation2 + $0x8] sm:$0xff]  ;;  %p2443_p13 = scmp.ge.s32.totalorder %s4397_s1, 2 }
 0x27e   : > { %s3300_s27 = smov (!%p2443_p13), 64  }
 0x27f   : > { %1041 = sbr.rel (%p2443_p13) target bundleno = 2117 (0x845), region = 136 }
 0x284   : > { %v1088_v56 = vld [vmem:[%s3808_s4 + $0x170] sm:$0xff]  ;;  %v1087_v57 = vld [vmem:[%s3808_s4 + $0x168] sm:$0xff]  ;;  %v1085_v58 = vld [vmem:[%s3808_s4 + $0x158] sm:$0xff]  ;;  %1219 = vmatprep.mubr.f32.mxu0 %v3866_v53  ;;  %1296 = vmatprep.mubr.f32.mxu1 %v3866_v53  ;;  %vm1453_vm0 = vcmask 130048  }
 0x285   : > { %1155 = vmatprep.subr.mxu0 %v1088_v56  ;;  %v1084_v59 = vld [vmem:[%s3808_s4 + $0x150] sm:$0xff]  ;;  %v1082_v60 = vld [vmem:[%s3808_s4 + $0x140] sm:$0xff]  ;;  %v1081_v61 = vld [vmem:[%s3808_s4 + $0x138] sm:$0xff] }
 0x286   : > { %1156 = vmatpush1.msra.mxu0 %v1087_v57  ;;  %v1079_v62 = vld [vmem:[%s3808_s4 + $0x128] sm:$0xff]  ;;  %v1078_v63 = vld [vmem:[%s3808_s4 + $0x120] sm:$0xff]  ;;  %v1076_v0 = vld [vmem:[%s3808_s4 + $0x110] sm:$0xff] }
 0x287   : > { %1157 = vmatprep.subr.mxu0 %v1085_v58  ;;  %v1075_v1 = vld [vmem:[%s3808_s4 + $0x108] sm:$0xff]  ;;  %v1073_v2 = vld [vmem:[%s3808_s4 + $0xf8] sm:$0xff]  ;;  %v1072_v3 = vld [vmem:[%s3808_s4 + $0xf0] sm:$0xff] }
 0x288   : > { %1158 = vmatpush1.msra.mxu0 %v1084_v59  ;;  %v1070_v4 = vld [vmem:[%s3808_s4 + $0xe0] sm:$0xff]  ;;  %v1069_v5 = vld [vmem:[%s3808_s4 + $0xd8] sm:$0xff]  ;;  %v1067_v6 = vld [vmem:[%s3808_s4 + $0xc8] sm:$0xff] }
 0x289   : > { %1159 = vmatprep.subr.mxu0 %v1082_v60  ;;  %v1066_v7 = vld [vmem:[%s3808_s4 + $0xc0] sm:$0xff]  ;;  %v1064_v8 = vld [vmem:[%s3808_s4 + $0xb0] sm:$0xff]  ;;  %v1063_v9 = vld [vmem:[%s3808_s4 + $0xa8] sm:$0xff]  ;;  %v1140_v60 = vlaneseq }
 0x28a   : > { %1160 = vmatpush1.msra.mxu0 %v1081_v61  ;;  %v1061_v10 = vld [vmem:[%s3808_s4 + $0x98] sm:$0xff]  ;;  %v1060_v11 = vld [vmem:[%s3808_s4 + $0x90] sm:$0xff]  ;;  %v1058_v12 = vld [vmem:[%s3808_s4 + $0x80] sm:$0xff] }
 0x28b   : > { %1161 = vmatprep.subr.mxu0 %v1079_v62  ;;  %v1057_v13 = vld [vmem:[%s3808_s4 + $0x78] sm:$0xff]  ;;  %v1055_v14 = vld [vmem:[%s3808_s4 + $0x68] sm:$0xff]  ;;  %v1054_v15 = vld [vmem:[%s3808_s4 + $0x60] sm:$0xff]  ;;  %v3942_v61 = vshrl.u32 %v1140_v60, 7 }
 0x28c   : > { %1162 = vmatpush1.msra.mxu0 %v1078_v63  ;;  %v1052_v16 = vld [vmem:[%s3808_s4 + $0x50] sm:$0xff]  ;;  %v1051_v17 = vld [vmem:[%s3808_s4 + $0x48] sm:$0xff]  ;;  %v1049_v18 = vld [vmem:[%s3808_s4 + $0x38] sm:$0xff] }
 0x28d   : > { %1163 = vmatprep.subr.mxu0 %v1076_v0  ;;  %v1048_v19 = vld [vmem:[%s3808_s4 + $0x30] sm:$0xff]  ;;  %v1046_v20 = vld [vmem:[%s3808_s4 + $0x20] sm:$0xff]  ;;  %v1045_v21 = vld [vmem:[%s3808_s4 + $0x18] sm:$0xff]  ;;  %v1142_v62 = vsub.s32 0, %v3942_v61 }
 0x28e   : > { %1164 = vmatpush1.msra.mxu0 %v1075_v1  ;;  %v1043_v22 = vld [vmem:[%s3808_s4 + $0x8] sm:$0xff]  ;;  %v1042_v23 = vld [vmem:[%s3808_s4] sm:$0xff]  ;;  %v1136_v24 = vld [vmem:[%s3808_s4 + $0x2f0] sm:$0xff] }
 0x28f   : > { %1165 = vmatprep.subr.mxu0 %v1073_v2  ;;  %v1135_v25 = vld [vmem:[%s3808_s4 + $0x2e8] sm:$0xff]  ;;  %v1133_v26 = vld [vmem:[%s3808_s4 + $0x2d8] sm:$0xff]  ;;  %v1132_v27 = vld [vmem:[%s3808_s4 + $0x2d0] sm:$0xff] }
 0x290   : > { %1166 = vmatpush1.msra.mxu0 %v1072_v3  ;;  %v1130_v28 = vld [vmem:[%s3808_s4 + $0x2c0] sm:$0xff]  ;;  %v1129_v29 = vld [vmem:[%s3808_s4 + $0x2b8] sm:$0xff]  ;;  %v1127_v30 = vld [vmem:[%s3808_s4 + $0x2a8] sm:$0xff]  ;;  %v1146_v3 = vsub.s32 1, %v3942_v61 }
 0x291   : > { %1167 = vmatprep.subr.mxu0 %v1070_v4  ;;  %v1126_v31 = vld [vmem:[%s3808_s4 + $0x2a0] sm:$0xff]  ;;  %v1124_v32 = vld [vmem:[%s3808_s4 + $0x290] sm:$0xff]  ;;  %v1123_v33 = vld [vmem:[%s3808_s4 + $0x288] sm:$0xff] }
 0x292   : > { %1168 = vmatpush1.msra.mxu0 %v1069_v5  ;;  %v1121_v34 = vld [vmem:[%s3808_s4 + $0x278] sm:$0xff]  ;;  %v1120_v35 = vld [vmem:[%s3808_s4 + $0x270] sm:$0xff]  ;;  %v1118_v36 = vld [vmem:[%s3808_s4 + $0x260] sm:$0xff] }
 0x293   : > { %1169 = vmatprep.subr.mxu0 %v1067_v6  ;;  %v1117_v37 = vld [vmem:[%s3808_s4 + $0x258] sm:$0xff]  ;;  %v1115_v38 = vld [vmem:[%s3808_s4 + $0x248] sm:$0xff]  ;;  %v1114_v39 = vld [vmem:[%s3808_s4 + $0x240] sm:$0xff] }
 0x294   : > { %1170 = vmatpush1.msra.mxu0 %v1066_v7  ;;  %v1112_v40 = vld [vmem:[%s3808_s4 + $0x230] sm:$0xff]  ;;  %v1111_v41 = vld [vmem:[%s3808_s4 + $0x228] sm:$0xff]  ;;  %v1109_v42 = vld [vmem:[%s3808_s4 + $0x218] sm:$0xff] }
 0x295   : > { %1171 = vmatprep.subr.mxu0 %v1064_v8  ;;  %v1108_v43 = vld [vmem:[%s3808_s4 + $0x210] sm:$0xff]  ;;  %v1106_v44 = vld [vmem:[%s3808_s4 + $0x200] sm:$0xff]  ;;  %v1105_v45 = vld [vmem:[%s3808_s4 + $0x1f8] sm:$0xff] }
 0x296   : > { %1172 = vmatpush1.msra.mxu0 %v1063_v9  ;;  %v1103_v46 = vld [vmem:[%s3808_s4 + $0x1e8] sm:$0xff]  ;;  %v1102_v47 = vld [vmem:[%s3808_s4 + $0x1e0] sm:$0xff]  ;;  %v1100_v48 = vld [vmem:[%s3808_s4 + $0x1d0] sm:$0xff] }
 0x297   : > { %1173 = vmatprep.subr.mxu0 %v1061_v10  ;;  %v1099_v49 = vld [vmem:[%s3808_s4 + $0x1c8] sm:$0xff]  ;;  %v1097_v50 = vld [vmem:[%s3808_s4 + $0x1b8] sm:$0xff]  ;;  %v1096_v51 = vld [vmem:[%s3808_s4 + $0x1b0] sm:$0xff] }
 0x298   : > { %1174 = vmatpush1.msra.mxu0 %v1060_v11  ;;  %v1094_v56 = vld [vmem:[%s3808_s4 + $0x1a0] sm:$0xff]  ;;  %v1093_v57 = vld [vmem:[%s3808_s4 + $0x198] sm:$0xff]  ;;  %v1091_v58 = vld [vmem:[%s3808_s4 + $0x188] sm:$0xff] }
 0x299   : > { %1175 = vmatprep.subr.mxu0 %v1058_v12  ;;  %v1090_v59 = vld [vmem:[%s3808_s4 + $0x180] sm:$0xff]  ;;  %v3946_v63 = vld [vmem:[%s3843_s9] sm:$0x7] }
 0x29a   : > { %1176 = vmatpush1.msra.mxu0 %v1057_v13  ;;  %v1143_v0 = vrot.slane %v3946_v63, %v1142_v62  ;;  %v1147_v7 = vrot.slane %v3946_v63, %v1146_v3  ;;  %v1137_v3 = vld [vmem:[%s3808_s4 + $0x2f8] sm:$0xff] }
 0x29b   : > { %1177 = vmatprep.subr.mxu0 %v1055_v14  ;;  %2464 = vmatprep.subr.mxu1 %v1137_v3 }
 0x29c   : > { %1178 = vmatpush1.msra.mxu0 %v1054_v15 }
 0x29d   : > { %1179 = vmatprep.subr.mxu0 %v1052_v16 }
 0x29e   : > { %1180 = vmatpush1.msra.mxu0 %v1051_v17 }
 0x29f   : > { %1181 = vmatprep.subr.mxu0 %v1049_v18 }
 0x2a0   : > { %1182 = vmatpush1.msra.mxu0 %v1048_v19 }
 0x2a1   : > { %1183 = vmatprep.subr.mxu0 %v1046_v20 }
 0x2a2   : > { %1184 = vmatpush1.msra.mxu0 %v1045_v21 }
 0x2a3   : > { %1185 = vmatprep.subr.mxu0 %v1043_v22 }
 0x2a4   : > { %1186 = vmatpush1.msra.mxu0 %v1042_v23 }
 0x2a5   : > { %1187 = vmatprep.subr.mxu0 %v1136_v24 }
 0x2a6   : > { %1188 = vmatpush2.msra.mxu0 %v1135_v25 }
 0x2a7   : > { %1189 = vmatprep.subr.mxu0 %v1133_v26 }
 0x2a8   : > { %1190 = vmatpush2.msra.mxu0 %v1132_v27 }
 0x2a9   : > { %1191 = vmatprep.subr.mxu0 %v1130_v28  ;;  %v2445_v28 = vld [vmem:[#allocation16] ss:$0 sm:$0xff] }
 0x2aa   : > { %1192 = vmatpush2.msra.mxu0 %v1129_v29 }
 0x2ab   : > { %1193 = vmatprep.subr.mxu0 %v1127_v30 }
 0x2ac   : > { %1194 = vmatpush2.msra.mxu0 %v1126_v31 }
 0x2ad   : > { %1195 = vmatprep.subr.mxu0 %v1124_v32 }
 0x2ae   : > { %1196 = vmatpush2.msra.mxu0 %v1123_v33 }
 0x2af   : > { %1197 = vmatprep.subr.mxu0 %v1121_v34 }
 0x2b0   : > { %1198 = vmatpush2.msra.mxu0 %v1120_v35 }
 0x2b1   : > { %1199 = vmatprep.subr.mxu0 %v1118_v36 }
 0x2b2   : > { %1200 = vmatpush2.msra.mxu0 %v1117_v37  ;;  %v2444_v37 = vld [vmem:[#allocation15] ss:$0 sm:$0xff] }
 0x2b3   : > { %1201 = vmatprep.subr.mxu0 %v1115_v38 }
 0x2b4   : > { %1202 = vmatpush2.msra.mxu0 %v1114_v39 }
 0x2b5   : > { %1203 = vmatprep.subr.mxu0 %v1112_v40 }
 0x2b6   : > { %1204 = vmatpush2.msra.mxu0 %v1111_v41  ;;  %v1357_v41 = vld [vmem:[#allocation13 + $0x8] sm:$0xff] }
 0x2b7   : > { %1205 = vmatprep.subr.mxu0 %v1109_v42  ;;  %v1355_v42 = vld [vmem:[#allocation12 + $0x8] sm:$0xff] }
 0x2b8   : > { %1206 = vmatpush2.msra.mxu0 %v1108_v43 }
 0x2b9   : > { %1207 = vmatprep.subr.mxu0 %v1106_v44 }
 0x2ba   : > { %1208 = vmatpush2.msra.mxu0 %v1105_v45 }
 0x2bb   : > { %1209 = vmatprep.subr.mxu0 %v1103_v46  ;;  %v1356_v46 = vld [vmem:[#allocation13] sm:$0xff] }
 0x2bc   : > { %1210 = vmatpush2.msra.mxu0 %v1102_v47 }
 0x2bd   : > { %1211 = vmatprep.subr.mxu0 %v1100_v48  ;;  %v1354_v48 = vld [vmem:[#allocation12] sm:$0xff] }
 0x2be   : > { %1212 = vmatpush2.msra.mxu0 %v1099_v49 }
 0x2bf   : > { %1213 = vmatprep.subr.mxu0 %v1097_v50 }
 0x2c0   : > { %1214 = vmatpush2.msra.mxu0 %v1096_v51 }
 0x2c1   : > { %1215 = vmatprep.subr.mxu0 %v1094_v56 }
 0x2c2   : > { %1216 = vmatpush2.msra.mxu0 %v1093_v57 }
 0x2c3   : > { %1217 = vmatprep.subr.mxu0 %v1091_v58 }
 0x2c4   : > { %1218 = vmatpush2.msra.mxu0 %v1090_v59 }
 0x2c5   : > { %1220 = vmatmul.mubr.f32.vlgmr.msra.gmra.mxu0 %v3864_v52 }
 0x2c6   : > { %1225 = vmatprep.mubr.f32.mxu0 %v3870_v55 }
 0x2c9   : > { %1226 = vmatmul.mubr.f32.gmra.mxu0 %v3868_v54 }
 0x385   : > { %v1221_v1 = vpop.f32.mrf.mxu0 }
 0x386   : > { %v1222_v2 = vadd.f32 %v1221_v1, %v1143_v0 }
 0x387   : > { %v1223_v4 = vpop.f32.mrf.mxu0 }
 0x388   : > { %v1308_v5 = vmul.f32 %v1222_v2, %v1222_v2  ;;  %v1224_v12 = vadd.f32 %v1223_v4, %v1147_v7  ;;  %v1089_v4 = vld [vmem:[%s3808_s4 + $0x178] sm:$0xff] }
 0x389   : > { %v1227_v6 = vpop.f32.mrf.mxu0  ;;  %2465 = vmatpush3.msra.mxu1 %v1089_v4 }
 0x38a   : > { %v1228_v8 = vadd.f32 %v1227_v6, %v1143_v0  ;;  %1310 = vadd.xlane.f32.xlu1 %v1308_v5  ;;  %v1332_v14 = vmul.f32 %v1224_v12, %v1224_v12  ;;  %v1134_v5 = vld [vmem:[%s3808_s4 + $0x2e0] sm:$0xff] }
 0x38b   : > { %v1229_v9 = vpop.f32.mrf.mxu0  ;;  %v1086_v6 = vld [vmem:[%s3808_s4 + $0x160] sm:$0xff]  ;;  %2466 = vmatprep.subr.mxu1 %v1134_v5 }
 0x38c   : > { %v1230_v10 = vadd.f32 %v1229_v9, %v1147_v7  ;;  %v1309_v11 = vmul.f32 %v1228_v8, %v1228_v8  ;;  %v1131_v7 = vld [vmem:[%s3808_s4 + $0x2c8] sm:$0xff]  ;;  %2467 = vmatpush3.msra.mxu1 %v1086_v6  ;;  %v1128_v9 = vld [vmem:[%s3808_s4 + $0x2b0] sm:$0xff] }
 0x38d   : > { %2468 = vmatprep.subr.mxu1 %v1131_v7 }
 0x38e   : > { %1312 = vadd.xlane.f32.xlu1 %v1309_v11  ;;  %v1333_v13 = vmul.f32 %v1230_v10, %v1230_v10  ;;  %v1125_v11 = vld [vmem:[%s3808_s4 + $0x298] sm:$0xff] }
 0x390   : > { %1336 = vadd.xlane.f32.xlu0 %v1333_v13  ;;  %v1122_v13 = vld [vmem:[%s3808_s4 + $0x280] sm:$0xff] }
 0x394   : > { %1334 = vadd.xlane.f32.xlu0 %v1332_v14  ;;  %v1074_v14 = vld [vmem:[%s3808_s4 + $0x100] sm:$0xff] }
 0x413   : > { %v1311_v15 = vpop.xlane.xlu1 %1310 }
 0x414   : > { %v1315_v16 = vmul.f32 0.0078125, %v1311_v15  ;;  %v1119_v15 = vld [vmem:[%s3808_s4 + $0x268] sm:$0xff] }
 0x416   : > { %v1317_v21 = vadd.f32 1e-06, %v1315_v16  ;;  %v1071_v16 = vld [vmem:[%s3808_s4 + $0xe8] sm:$0xff] }
 0x417   : > { %v1313_v19 = vpop.xlane.xlu1 %1312 }
 0x418   : > { %v1316_v23 = vmul.f32 0.0078125, %v1313_v19  ;;  %v1113_v19 = vld [vmem:[%s3808_s4 + $0x238] sm:$0xff] }
 0x419   : > { %v1337_v17 = vpop.xlane.xlu0 %1336 }
 0x41a   : > { %v1339_v18 = vmul.f32 0.0078125, %v1337_v17  ;;  %v1318_v26 = vadd.f32 1e-06, %v1316_v23  ;;  %v1116_v17 = vld [vmem:[%s3808_s4 + $0x250] sm:$0xff]  ;;  %v1107_v23 = vld [vmem:[%s3808_s4 + $0x208] sm:$0xff] }
 0x41c   : > { %v1341_v20 = vadd.f32 1e-06, %v1339_v18  ;;  %v1068_v18 = vld [vmem:[%s3808_s4 + $0xd0] sm:$0xff] }
 0x41d   : > { %v1335_v22 = vpop.xlane.xlu0 %1334 }
 0x41e   : > { %2746 = vrsqrt.f32 %v1341_v20  ;;  %v1338_v24 = vmul.f32 0.0078125, %v1335_v22  ;;  %v1065_v20 = vld [vmem:[%s3808_s4 + $0xb8] sm:$0xff]  ;;  %v1062_v22 = vld [vmem:[%s3808_s4 + $0xa0] sm:$0xff] }
 0x41f   : > { %2748 = vrsqrt.f32 %v1317_v21  ;;  %v1110_v21 = vld [vmem:[%s3808_s4 + $0x220] sm:$0xff] }
 0x420   : > { %v1340_v25 = vadd.f32 1e-06, %v1338_v24  ;;  %v1059_v24 = vld [vmem:[%s3808_s4 + $0x88] sm:$0xff] }
 0x422   : > { %2750 = vrsqrt.f32 %v1340_v25  ;;  %v1104_v25 = vld [vmem:[%s3808_s4 + $0x1f0] sm:$0xff] }
 0x423   : > { %2752 = vrsqrt.f32 %v1318_v26  ;;  %v1056_v26 = vld [vmem:[%s3808_s4 + $0x70] sm:$0xff] }
 0x42b   : > { %v2747_v27 = vpop.eup %2746 }
 0x42c   : > { %v1345_v29 = vmul.f32 %v2747_v27, %v1230_v10  ;;  %v2749_v30 = vpop.eup %2748  ;;  %v1080_v10 = vld [vmem:[%s3808_s4 + $0x130] sm:$0xff]  ;;  %v1101_v27 = vld [vmem:[%s3808_s4 + $0x1d8] sm:$0xff] }
 0x42d   : > { %v1321_v35 = vmul.f32 %v2749_v30, %v1222_v2  ;;  %v1050_v30 = vld [vmem:[%s3808_s4 + $0x40] sm:$0xff] }
 0x42e   : > { %v1353_v31 = vmul.f32 %v2445_v28, %v1345_v29  ;;  %v1098_v29 = vld [vmem:[%s3808_s4 + $0x1c0] sm:$0xff] }
 0x42f   : > { %v2751_v32 = vpop.eup %2750  ;;  %v1329_v38 = vmul.f32 %v2444_v37, %v1321_v35 }
 0x430   : > { %1372 = vrot.lane.b32.xlu0 %v1353_v31, %s3300_s27  ;;  %v1344_v33 = vmul.f32 %v2751_v32, %v1224_v12  ;;  %v2753_v36 = vpop.eup %2752  ;;  %v1369_v44 = vmul.f32 %v1355_v42, %v1353_v31  ;;  %v1077_v12 = vld [vmem:[%s3808_s4 + $0x118] sm:$0xff]  ;;  %v1095_v31 = vld [vmem:[%s3808_s4 + $0x1a8] sm:$0xff] }
 0x431   : > { %v1322_v39 = vmul.f32 %v2753_v36, %v1228_v8  ;;  %v1358_v58 = vmul.f32 %v1354_v48, %v1329_v38  ;;  %v1083_v8 = vld [vmem:[%s3808_s4 + $0x148] sm:$0xff] }
 0x432   : > { %v1352_v34 = vmul.f32 %v2445_v28, %v1344_v33  ;;  %2469 = vmatpush3.msra.mxu1 %v1083_v8  ;;  %v1053_v28 = vld [vmem:[%s3808_s4 + $0x58] sm:$0xff]  ;;  %v1047_v32 = vld [vmem:[%s3808_s4 + $0x28] sm:$0xff]  ;;  %v1092_v33 = vld [vmem:[%s3808_s4 + $0x190] sm:$0xff] }
 0x433   : > { %v1330_v40 = vmul.f32 %v2444_v37, %v1322_v39  ;;  %2470 = vmatprep.subr.mxu1 %v1128_v9 }
 0x434   : > { %1370 = vrot.lane.b32.xlu1 %v1352_v34, %s3300_s27  ;;  %v1368_v50 = vmul.f32 %v1354_v48, %v1352_v34  ;;  %2471 = vmatpush3.msra.mxu1 %v1080_v10  ;;  %v1044_v34 = vld [vmem:[%s3808_s4 + $0x10] sm:$0xff] }
 0x435   : > { %v1359_v0 = vmul.f32 %v1355_v42, %v1330_v40  ;;  %2472 = vmatprep.subr.mxu1 %v1125_v11 }
 0x436   : > { %2473 = vmatpush3.msra.mxu1 %v1077_v12  ;;  %v1597_v12 = vld [vmem:[%s3816_s19 + $0xf0] sm:$0xff] }
 0x437   : > { %2474 = vmatprep.subr.mxu1 %v1122_v13  ;;  %v1596_v13 = vld [vmem:[%s3816_s19 + $0xe8] sm:$0xff] }
 0x438   : > { %1360 = vrot.lane.b32.xlu1 %v1329_v38, %s3300_s27  ;;  %2475 = vmatpush3.msra.mxu1 %v1074_v14  ;;  %v1595_v14 = vld [vmem:[%s3816_s19 + $0xe0] sm:$0xff] }
 0x439   : > { %2476 = vmatprep.subr.mxu1 %v1119_v15  ;;  %v1594_v15 = vld [vmem:[%s3816_s19 + $0xd8] sm:$0xff] }
 0x43a   : > { %2477 = vmatpush3.msra.mxu1 %v1071_v16  ;;  %v1593_v16 = vld [vmem:[%s3816_s19 + $0xd0] sm:$0xff] }
 0x43b   : > { %2478 = vmatprep.subr.mxu1 %v1116_v17  ;;  %v1592_v17 = vld [vmem:[%s3816_s19 + $0xc8] sm:$0xff] }
 0x43c   : > { %1362 = vrot.lane.b32.xlu1 %v1330_v40, %s3300_s27  ;;  %2479 = vmatpush3.msra.mxu1 %v1068_v18  ;;  %v1591_v18 = vld [vmem:[%s3816_s19 + $0xc0] sm:$0xff] }
 0x43d   : > { %2480 = vmatprep.subr.mxu1 %v1113_v19  ;;  %v1590_v19 = vld [vmem:[%s3816_s19 + $0xb8] sm:$0xff] }
 0x43e   : > { %2481 = vmatpush3.msra.mxu1 %v1065_v20  ;;  %v1589_v20 = vld [vmem:[%s3816_s19 + $0xb0] sm:$0xff] }
 0x43f   : > { %2482 = vmatprep.subr.mxu1 %v1110_v21  ;;  %v1588_v21 = vld [vmem:[%s3816_s19 + $0xa8] sm:$0xff] }
 0x440   : > { %2483 = vmatpush3.msra.mxu1 %v1062_v22  ;;  %v1587_v22 = vld [vmem:[%s3816_s19 + $0xa0] sm:$0xff] }
 0x441   : > { %2484 = vmatprep.subr.mxu1 %v1107_v23  ;;  %v1586_v23 = vld [vmem:[%s3816_s19 + $0x98] sm:$0xff] }
 0x442   : > { %2485 = vmatpush3.msra.mxu1 %v1059_v24  ;;  %v1585_v24 = vld [vmem:[%s3816_s19 + $0x90] sm:$0xff] }
 0x443   : > { %2486 = vmatprep.subr.mxu1 %v1104_v25  ;;  %v1584_v25 = vld [vmem:[%s3816_s19 + $0x88] sm:$0xff] }
 0x444   : > { %2487 = vmatpush3.msra.mxu1 %v1056_v26  ;;  %v1583_v26 = vld [vmem:[%s3816_s19 + $0x80] sm:$0xff] }
 0x445   : > { %2488 = vmatprep.subr.mxu1 %v1101_v27  ;;  %v1582_v27 = vld [vmem:[%s3816_s19 + $0x78] sm:$0xff] }
 0x446   : > { %2489 = vmatpush3.msra.mxu1 %v1053_v28  ;;  %v1581_v28 = vld [vmem:[%s3816_s19 + $0x70] sm:$0xff] }
 0x447   : > { %2490 = vmatprep.subr.mxu1 %v1098_v29  ;;  %v1580_v29 = vld [vmem:[%s3816_s19 + $0x68] sm:$0xff] }
 0x448   : > { %2491 = vmatpush3.msra.mxu1 %v1050_v30  ;;  %v1579_v30 = vld [vmem:[%s3816_s19 + $0x60] sm:$0xff] }
 0x449   : > { %2492 = vmatprep.subr.mxu1 %v1095_v31  ;;  %v1578_v31 = vld [vmem:[%s3816_s19 + $0x58] sm:$0xff] }
 0x44a   : > { %2493 = vmatpush3.msra.mxu1 %v1047_v32  ;;  %v1577_v32 = vld [vmem:[%s3816_s19 + $0x50] sm:$0xff] }
 0x44b   : > { %2494 = vmatprep.subr.mxu1 %v1092_v33  ;;  %v1576_v33 = vld [vmem:[%s3816_s19 + $0x48] sm:$0xff] }
 0x44c   : > { %2495 = vmatpush3.msra.mxu1 %v1044_v34  ;;  %v1575_v34 = vld [vmem:[%s3816_s19 + $0x40] sm:$0xff] }
 0x44d   : > { %1297 = vmatmul.mubr.f32.vlgmr.msra.gmra.mxu1 %v3864_v52 }
 0x44e   : > { %1301 = vmatprep.mubr.f32.mxu1 %v3870_v55 }
 0x451   : > { %1302 = vmatmul.mubr.f32.gmra.mxu1 %v3868_v54 }
 0x4a2   : > { %v1373_v43 = vpop.permute.xlu0 %1372 }
 0x4a3   : > { %v1375_v45 = vmul.f32 %v1373_v43, %v1357_v41 }
 0x4a5   : > { %v1377_v47 = vadd.f32 %v1375_v45, %v1369_v44 }
 0x4a6   : > { %v1371_v49 = vpop.permute.xlu1 %1370 }
 0x4a7   : > { %v1374_v51 = vmul.f32 %v1371_v49, %v1356_v46  ;;  %2510 = vmatprep.subr.mxu0 %v1377_v47 }
 0x4a8   : > { %2511 = vmatpush3.xpose.msra.mxu0 %v1377_v47 }
 0x4a9   : > { %v1376_v56 = vadd.f32 %v1374_v51, %v1368_v50  ;;  %v1150_v51 = vsub.s32 2, %v3942_v61 }
 0x4aa   : > { %v1361_v57 = vpop.permute.xlu1 %1360 }
 0x4ab   : > { %v1364_v59 = vmul.f32 %v1361_v57, %v1356_v46  ;;  %2512 = vmatprep.subr.mxu0 %v1376_v56  ;;  %v1151_v57 = vrot.slane %v3946_v63, %v1150_v51  ;;  %v1565_v51 = vld [vmem:[#allocation3 + $0x8] sm:$0xff] }
 0x4ac   : > { %2513 = vmatpush3.xpose.msra.mxu0 %v1376_v56 }
 0x4ad   : > { %v1366_v60 = vadd.f32 %v1364_v59, %v1358_v58 }
 0x4ae   : > { %v1363_v62 = vpop.permute.xlu1 %1362 }
 0x4af   : > { %v1365_v1 = vmul.f32 %v1363_v62, %v1357_v41  ;;  %2514 = vmatprep.mubr.f32.mxu0 %v1366_v60 }
 0x4b1   : > { %v1367_v2 = vadd.f32 %v1365_v1, %v1359_v0  ;;  %v1598_v1 = vld [vmem:[%s3816_s19 + $0xf8] sm:$0xff] }
 0x4b3   : > { %2515 = vmatmul.mubr.f32.vlgmr.msra.gmra.mxu0 %v1367_v2 }
 0x50d   : > { %v2496_v49 = vpop.f32.mrf.mxu1 }
 0x50f   : > { %v2497_v50 = vpop.f32.mrf.mxu1 }
 0x510   : > { %v2498_v58 = vadd.f32 %v2497_v50, %v2496_v49 }
 0x511   : > { %v2499_v56 = vpop.f32.mrf.mxu1 }
 0x512   : > { %v1299_v62 = vadd.f32 %v2498_v58, %v1151_v57  ;;  %v1566_v58 = vld [vmem:[#allocation3 + $0x10] sm:$0xff] }
 0x513   : > { %v2500_v59 = vpop.f32.mrf.mxu1 }
 0x514   : > { %v2501_v60 = vadd.f32 %v2500_v59, %v2499_v56 }
 0x516   : > { %v1304_v0 = vadd.f32 %v2501_v60, %v1151_v57 }
 0x518   : > { %2517 = vmatprep.subr.mxu1 %v1304_v0 }
 0x519   : > { %2518 = vmatpush3.msra.mxu1 %v1304_v0 }
 0x51a   : > { %2519 = vmatprep.subr.mxu1 %v1299_v62 }
 0x51b   : > { %2520 = vmatpush3.msra.mxu1 %v1299_v62 }
 0x51c   : > { %1599 = vmatprep.subr.mxu1 %v1598_v1 }
 0x573   : > { %v2516_v35 = vpop.f32.mrf.mxu0 }
 0x574   : > { %v1457_v36 = vsel %vm1453_vm0, %v2516_v35, -inf }
 0x575   : > { %1458 = vmax.xlane.f32.xlu1 %v1457_v36  ;;  %v1444_v37 = vpop.f32.mrf.mxu0  ;;  %v1573_v36 = vld [vmem:[%s3816_s19 + $0x30] sm:$0xff] }
 0x576   : > { %v1454_v38 = vsel %vm1453_vm0, %v1444_v37, -inf }
 0x577   : > { %1455 = vmax.xlane.f32.xlu0 %v1454_v38  ;;  %v1571_v38 = vld [vmem:[%s3816_s19 + $0x20] sm:$0xff] }
 0x5fe   : > { %v1459_v39 = vpop.xlane.xlu1 %1458 }
 0x5ff   : > { %v1461_v40 = vsub.f32 %v2516_v35, %v1459_v39  ;;  %v1574_v35 = vld [vmem:[%s3816_s19 + $0x38] sm:$0xff] }
 0x600   : > { %v1456_v41 = vpop.xlane.xlu0 %1455  ;;  %v1570_v39 = vld [vmem:[%s3816_s19 + $0x18] sm:$0xff] }
 0x601   : > { %v1460_v42 = vsub.f32 %v1444_v37, %v1456_v41  ;;  %v1464_v43 = vmul.f32 1.442695, %v1461_v40  ;;  %v1572_v37 = vld [vmem:[%s3816_s19 + $0x28] sm:$0xff]  ;;  %v1569_v40 = vld [vmem:[%s3816_s19 + $0x10] sm:$0xff] }
 0x602   : > { %v1568_v41 = vld [vmem:[%s3816_s19 + $0x8] sm:$0xff] }
 0x603   : > { %v1462_v44 = vmul.f32 1.442695, %v1460_v42  ;;  %v1567_v42 = vld [vmem:[%s3816_s19] sm:$0xff] }
 0x605   : > { %2754 = vpow2.f32 %v1462_v44 }
 0x606   : > { %2756 = vpow2.f32 %v1464_v43  ;;  %v3301_v43 = vmov 0.0  }
 0x612   : > { %v2755_v45 = vpop.eup %2754 }
 0x613   : > { %v1466_v46 = vsel %vm1453_vm0, %v2755_v45, 0.0  ;;  %v2757_v47 = vpop.eup %2756 }
 0x614   : > { %1467 = vadd.xlane.f32.xlu0 %v1466_v46  ;;  %v1469_v48 = vsel %vm1453_vm0, %v2757_v47, 0.0  ;;  %v1563_v46 = vld [vmem:[#allocation3] sm:$0xff] }
 0x618   : > { %1470 = vadd.xlane.f32.xlu0 %v1469_v48  ;;  %v1564_v48 = vld [vmem:[#allocation3 + $0x18] sm:$0xff] }
 0x69d   : > { %v1468_v2 = vpop.xlane.xlu0 %1467 }
 0x69e   : > { %2758 = vrcp.f32 %v1468_v2 }
 0x6a1   : > { %v1471_v3 = vpop.xlane.xlu0 %1470 }
 0x6a2   : > { %2760 = vrcp.f32 %v1471_v3 }
 0x6ab   : > { %v2759_v61 = vpop.eup %2758 }
 0x6ac   : > { %v1474_v63 = vmul.f32 %v2759_v61, %v1468_v2 }
 0x6ae   : > { %v1476_v4 = vsub.f32 2.0, %v1474_v63 }
 0x6af   : > { %v2761_v5 = vpop.eup %2760 }
 0x6b0   : > { %v1478_v6 = vmul.f32 %v2759_v61, %v1476_v4  ;;  %v1475_v7 = vmul.f32 %v2761_v5, %v1471_v3 }
 0x6b2   : > { %v1480_v8 = vmul.f32 %v2755_v45, %v1478_v6  ;;  %v1477_v9 = vsub.f32 2.0, %v1475_v7 }
 0x6b4   : > { %v1479_v10 = vmul.f32 %v2761_v5, %v1477_v9  ;;  %2521 = vmatprep.mubr.msk.f32.mxu1 %vm1453_vm0, %v1480_v8 }
 0x6b6   : > { %v1481_v11 = vmul.f32 %v2757_v47, %v1479_v10 }
 0x6b8   : > { %2522 = vmatmul.mubr.msk.f32.vlgmr.msra.gmra.mxu1 %vm1453_vm0, %v1481_v11 }
 0x6b9   : > { %1600 = vmatpush1.msra.mxu1 %v1597_v12  ;;  %1663 = vmatprep.mubr.f32.mxu1 %v3301_v43 }
 0x6ba   : > { %1601 = vmatprep.subr.mxu1 %v1596_v13 }
 0x6bb   : > { %1602 = vmatpush1.msra.mxu1 %v1595_v14 }
 0x6bc   : > { %1603 = vmatprep.subr.mxu1 %v1594_v15 }
 0x6bd   : > { %1604 = vmatpush1.msra.mxu1 %v1593_v16 }
 0x6be   : > { %1605 = vmatprep.subr.mxu1 %v1592_v17 }
 0x6bf   : > { %1606 = vmatpush1.msra.mxu1 %v1591_v18 }
 0x6c0   : > { %1607 = vmatprep.subr.mxu1 %v1590_v19 }
 0x6c1   : > { %1608 = vmatpush1.msra.mxu1 %v1589_v20 }
 0x6c2   : > { %1609 = vmatprep.subr.mxu1 %v1588_v21 }
 0x6c3   : > { %1610 = vmatpush1.msra.mxu1 %v1587_v22 }
 0x6c4   : > { %1611 = vmatprep.subr.mxu1 %v1586_v23 }
 0x6c5   : > { %1612 = vmatpush1.msra.mxu1 %v1585_v24 }
 0x6c6   : > { %1613 = vmatprep.subr.mxu1 %v1584_v25 }
 0x6c7   : > { %1614 = vmatpush1.msra.mxu1 %v1583_v26 }
 0x6c8   : > { %1615 = vmatprep.subr.mxu1 %v1582_v27 }
 0x6c9   : > { %1616 = vmatpush1.msra.mxu1 %v1581_v28 }
 0x6ca   : > { %1617 = vmatprep.subr.mxu1 %v1580_v29 }
 0x6cb   : > { %1618 = vmatpush1.msra.mxu1 %v1579_v30 }
 0x6cc   : > { %1619 = vmatprep.subr.mxu1 %v1578_v31 }
 0x6cd   : > { %1620 = vmatpush1.msra.mxu1 %v1577_v32 }
 0x6ce   : > { %1621 = vmatprep.subr.mxu1 %v1576_v33 }
 0x6cf   : > { %1622 = vmatpush1.msra.mxu1 %v1575_v34 }
 0x6d0   : > { %1623 = vmatprep.subr.mxu1 %v1574_v35 }
 0x6d1   : > { %1624 = vmatpush1.msra.mxu1 %v1573_v36 }
 0x6d2   : > { %1625 = vmatprep.subr.mxu1 %v1572_v37 }
 0x6d3   : > { %1626 = vmatpush1.msra.mxu1 %v1571_v38 }
 0x6d4   : > { %1627 = vmatprep.subr.mxu1 %v1570_v39 }
 0x6d5   : > { %1628 = vmatpush1.msra.mxu1 %v1569_v40 }
 0x6d6   : > { %1629 = vmatprep.subr.mxu1 %v1568_v41 }
 0x6d7   : > { %1630 = vmatpush1.msra.mxu1 %v1567_v42 }
 0x778   : > { %v2523_v44 = vpop.f32.mrf.mxu1 }
 0x77a   : > { %v1554_v45 = vpop.f32.mrf.mxu1 }
 0x77b   : > { %1664 = vmatmul.mubr.f32.vlgmr.msra.gmra.mxu1 %v1554_v45 }
 0x77c   : > { %1669 = vmatprep.mubr.f32.mxu1 %v3301_v43 }
 0x77f   : > { %1670 = vmatmul.mubr.f32.gmra.mxu1 %v2523_v44 }
 0x83b   : > { %v1665_v47 = vpop.f32.mrf.mxu1 }
 0x83c   : > { %v1676_v49 = vadd.f32 %v1665_v47, %v1563_v46 }
 0x83d   : > { %v1667_v50 = vpop.f32.mrf.mxu1 }
 0x83e   : > { %1680 = vst [vmem:[#allocation3] sm:$0xff] %v1676_v49  ;;  %v1677_v56 = vadd.f32 %v1667_v50, %v1564_v48 }
 0x83f   : > { %v1671_v57 = vpop.f32.mrf.mxu1 }
 0x840   : > { %1681 = vst [vmem:[#allocation3 + $0x18] sm:$0xff] %v1677_v56  ;;  %v1678_v59 = vadd.f32 %v1671_v57, %v1565_v51 }
 0x841   : > { %v1673_v60 = vpop.f32.mrf.mxu1 }
 0x842   : > { %1682 = vst [vmem:[#allocation3 + $0x8] sm:$0xff] %v1678_v59  ;;  %v1679_v62 = vadd.f32 %v1673_v60, %v1566_v58 }
 0x844   : > { %1683 = vst [vmem:[#allocation3 + $0x10] sm:$0xff] %v1679_v62 }
 0x845 PF: > { %s4398_s4 = sld [smem:[#allocation39_spill]] }
 0x84b   : > { %p2448_p9 = scmp.lt.s32.totalorder %s4398_s4, 2 }
 0x84d   : > { %1687 = sbr.rel (%p2448_p9) target bundleno = 2623 (0xa3f), region = 140 }
 0x852   : > { %v1719_v0 = vld [vmem:[%s3823_s11 + $0xf8] sm:$0xff]  ;;  %v1718_v1 = vld [vmem:[%s3823_s11 + $0xf0] sm:$0xff]  ;;  %v1717_v2 = vld [vmem:[%s3823_s11 + $0xe8] sm:$0xff]  ;;  %1828 = vmatprep.mubr.f32.mxu0 %v3866_v53 }
 0x853   : > { %1764 = vmatprep.subr.mxu0 %v1719_v0  ;;  %v1716_v3 = vld [vmem:[%s3823_s11 + $0xe0] sm:$0xff]  ;;  %v1715_v61 = vld [vmem:[%s3823_s11 + $0xd8] sm:$0xff]  ;;  %v1714_v63 = vld [vmem:[%s3823_s11 + $0xd0] sm:$0xff] }
 0x854   : > { %1765 = vmatpush1.msra.mxu0 %v1718_v1  ;;  %v1713_v4 = vld [vmem:[%s3823_s11 + $0xc8] sm:$0xff]  ;;  %v1712_v5 = vld [vmem:[%s3823_s11 + $0xc0] sm:$0xff]  ;;  %v1711_v6 = vld [vmem:[%s3823_s11 + $0xb8] sm:$0xff] }
 0x855   : > { %1766 = vmatprep.subr.mxu0 %v1717_v2  ;;  %v1710_v53 = vld [vmem:[%s3823_s11 + $0xb0] sm:$0xff]  ;;  %v1709_v7 = vld [vmem:[%s3823_s11 + $0xa8] sm:$0xff]  ;;  %v1708_v8 = vld [vmem:[%s3823_s11 + $0xa0] sm:$0xff] }
 0x856   : > { %1767 = vmatpush1.msra.mxu0 %v1716_v3  ;;  %v1707_v9 = vld [vmem:[%s3823_s11 + $0x98] sm:$0xff]  ;;  %v1706_v10 = vld [vmem:[%s3823_s11 + $0x90] sm:$0xff]  ;;  %v1705_v11 = vld [vmem:[%s3823_s11 + $0x88] sm:$0xff] }
 0x857   : > { %1768 = vmatprep.subr.mxu0 %v1715_v61  ;;  %v1704_v12 = vld [vmem:[%s3823_s11 + $0x80] sm:$0xff]  ;;  %v1703_v13 = vld [vmem:[%s3823_s11 + $0x78] sm:$0xff]  ;;  %v1702_v14 = vld [vmem:[%s3823_s11 + $0x70] sm:$0xff] }
 0x858   : > { %1769 = vmatpush1.msra.mxu0 %v1714_v63  ;;  %v1701_v15 = vld [vmem:[%s3823_s11 + $0x68] sm:$0xff]  ;;  %v1700_v16 = vld [vmem:[%s3823_s11 + $0x60] sm:$0xff]  ;;  %v1699_v17 = vld [vmem:[%s3823_s11 + $0x58] sm:$0xff] }
 0x859   : > { %1770 = vmatprep.subr.mxu0 %v1713_v4  ;;  %v1698_v18 = vld [vmem:[%s3823_s11 + $0x50] sm:$0xff]  ;;  %v1697_v19 = vld [vmem:[%s3823_s11 + $0x48] sm:$0xff]  ;;  %v1696_v20 = vld [vmem:[%s3823_s11 + $0x40] sm:$0xff] }
 0x85a   : > { %1771 = vmatpush1.msra.mxu0 %v1712_v5  ;;  %v1912_v21 = vld [vmem:[%s3829_s6 + $0xf8] sm:$0xff]  ;;  %v1911_v22 = vld [vmem:[%s3829_s6 + $0xf0] sm:$0xff]  ;;  %v1910_v24 = vld [vmem:[%s3829_s6 + $0xe8] sm:$0xff] }
 0x85b   : > { %1772 = vmatprep.subr.mxu0 %v1711_v6  ;;  %v1695_v23 = vld [vmem:[%s3823_s11 + $0x38] sm:$0xff]  ;;  %1945 = vmatprep.subr.mxu1 %v1912_v21  ;;  %v1909_v25 = vld [vmem:[%s3829_s6 + $0xe0] sm:$0xff]  ;;  %v1694_v26 = vld [vmem:[%s3823_s11 + $0x30] sm:$0xff] }
 0x85c   : > { %1773 = vmatpush1.msra.mxu0 %v1710_v53  ;;  %1946 = vmatpush1.msra.mxu1 %v1911_v22  ;;  %v1908_v27 = vld [vmem:[%s3829_s6 + $0xd8] sm:$0xff]  ;;  %v1693_v28 = vld [vmem:[%s3823_s11 + $0x28] sm:$0xff]  ;;  %v1907_v29 = vld [vmem:[%s3829_s6 + $0xd0] sm:$0xff] }
 0x85d   : > { %1774 = vmatprep.subr.mxu0 %v1709_v7  ;;  %1947 = vmatprep.subr.mxu1 %v1910_v24  ;;  %v1692_v30 = vld [vmem:[%s3823_s11 + $0x20] sm:$0xff]  ;;  %v1906_v31 = vld [vmem:[%s3829_s6 + $0xc8] sm:$0xff]  ;;  %v1691_v32 = vld [vmem:[%s3823_s11 + $0x18] sm:$0xff] }
 0x85e   : > { %1775 = vmatpush1.msra.mxu0 %v1708_v8  ;;  %1948 = vmatpush1.msra.mxu1 %v1909_v25  ;;  %v1905_v33 = vld [vmem:[%s3829_s6 + $0xc0] sm:$0xff]  ;;  %v1690_v34 = vld [vmem:[%s3823_s11 + $0x10] sm:$0xff]  ;;  %v1904_v35 = vld [vmem:[%s3829_s6 + $0xb8] sm:$0xff] }
 0x85f   : > { %1776 = vmatprep.subr.mxu0 %v1707_v9  ;;  %1949 = vmatprep.subr.mxu1 %v1908_v27  ;;  %v1689_v36 = vld [vmem:[%s3823_s11 + $0x8] sm:$0xff]  ;;  %v1903_v37 = vld [vmem:[%s3829_s6 + $0xb0] sm:$0xff]  ;;  %v1688_v38 = vld [vmem:[%s3823_s11] sm:$0xff] }
 0x860   : > { %1777 = vmatpush1.msra.mxu0 %v1706_v10  ;;  %1950 = vmatpush1.msra.mxu1 %v1907_v29  ;;  %v1902_v39 = vld [vmem:[%s3829_s6 + $0xa8] sm:$0xff]  ;;  %v1751_v40 = vld [vmem:[%s3823_s11 + $0x1f8] sm:$0xff]  ;;  %v1901_v41 = vld [vmem:[%s3829_s6 + $0xa0] sm:$0xff] }
 0x861   : > { %1778 = vmatprep.subr.mxu0 %v1705_v11  ;;  %1951 = vmatprep.subr.mxu1 %v1906_v31  ;;  %v1750_v42 = vld [vmem:[%s3823_s11 + $0x1f0] sm:$0xff]  ;;  %v1900_v43 = vld [vmem:[%s3829_s6 + $0x98] sm:$0xff]  ;;  %v1749_v44 = vld [vmem:[%s3823_s11 + $0x1e8] sm:$0xff] }
 0x862   : > { %1779 = vmatpush1.msra.mxu0 %v1704_v12  ;;  %1952 = vmatpush1.msra.mxu1 %v1905_v33  ;;  %v1899_v45 = vld [vmem:[%s3829_s6 + $0x90] sm:$0xff]  ;;  %v1748_v46 = vld [vmem:[%s3823_s11 + $0x1e0] sm:$0xff]  ;;  %v1898_v47 = vld [vmem:[%s3829_s6 + $0x88] sm:$0xff] }
 0x863   : > { %1780 = vmatprep.subr.mxu0 %v1703_v13  ;;  %1953 = vmatprep.subr.mxu1 %v1904_v35  ;;  %v1747_v48 = vld [vmem:[%s3823_s11 + $0x1d8] sm:$0xff]  ;;  %v1897_v49 = vld [vmem:[%s3829_s6 + $0x80] sm:$0xff]  ;;  %v1746_v50 = vld [vmem:[%s3823_s11 + $0x1d0] sm:$0xff] }
 0x864   : > { %1781 = vmatpush1.msra.mxu0 %v1702_v14  ;;  %1954 = vmatpush1.msra.mxu1 %v1903_v37  ;;  %v1896_v51 = vld [vmem:[%s3829_s6 + $0x78] sm:$0xff]  ;;  %v1745_v56 = vld [vmem:[%s3823_s11 + $0x1c8] sm:$0xff]  ;;  %v1895_v57 = vld [vmem:[%s3829_s6 + $0x70] sm:$0xff] }
 0x865   : > { %1782 = vmatprep.subr.mxu0 %v1701_v15  ;;  %1955 = vmatprep.subr.mxu1 %v1902_v39  ;;  %v1744_v58 = vld [vmem:[%s3823_s11 + $0x1c0] sm:$0xff]  ;;  %v1894_v59 = vld [vmem:[%s3829_s6 + $0x68] sm:$0xff]  ;;  %v1743_v60 = vld [vmem:[%s3823_s11 + $0x1b8] sm:$0xff] }
 0x866   : > { %1783 = vmatpush1.msra.mxu0 %v1700_v16  ;;  %1956 = vmatpush1.msra.mxu1 %v1901_v41  ;;  %v1893_v62 = vld [vmem:[%s3829_s6 + $0x60] sm:$0xff]  ;;  %v1742_v0 = vld [vmem:[%s3823_s11 + $0x1b0] sm:$0xff]  ;;  %v1892_v1 = vld [vmem:[%s3829_s6 + $0x58] sm:$0xff] }
 0x867   : > { %1784 = vmatprep.subr.mxu0 %v1699_v17  ;;  %1957 = vmatprep.subr.mxu1 %v1900_v43  ;;  %v1741_v2 = vld [vmem:[%s3823_s11 + $0x1a8] sm:$0xff]  ;;  %v1891_v3 = vld [vmem:[%s3829_s6 + $0x50] sm:$0xff]  ;;  %v1740_v61 = vld [vmem:[%s3823_s11 + $0x1a0] sm:$0xff] }
 0x868   : > { %1785 = vmatpush1.msra.mxu0 %v1698_v18  ;;  %1958 = vmatpush1.msra.mxu1 %v1899_v45  ;;  %v1890_v63 = vld [vmem:[%s3829_s6 + $0x48] sm:$0xff]  ;;  %v1739_v4 = vld [vmem:[%s3823_s11 + $0x198] sm:$0xff]  ;;  %v1889_v5 = vld [vmem:[%s3829_s6 + $0x40] sm:$0xff] }
 0x869   : > { %1786 = vmatprep.subr.mxu0 %v1697_v19  ;;  %1959 = vmatprep.subr.mxu1 %v1898_v47  ;;  %v1738_v6 = vld [vmem:[%s3823_s11 + $0x190] sm:$0xff]  ;;  %v1888_v53 = vld [vmem:[%s3829_s6 + $0x38] sm:$0xff]  ;;  %v1737_v7 = vld [vmem:[%s3823_s11 + $0x188] sm:$0xff] }
 0x86a   : > { %1787 = vmatpush1.msra.mxu0 %v1696_v20  ;;  %1960 = vmatpush1.msra.mxu1 %v1897_v49  ;;  %v1887_v8 = vld [vmem:[%s3829_s6 + $0x30] sm:$0xff]  ;;  %v1736_v9 = vld [vmem:[%s3823_s11 + $0x180] sm:$0xff]  ;;  %v1886_v10 = vld [vmem:[%s3829_s6 + $0x28] sm:$0xff] }
 0x86b   : > { %1788 = vmatprep.subr.mxu0 %v1695_v23  ;;  %1961 = vmatprep.subr.mxu1 %v1896_v51  ;;  %v1735_v11 = vld [vmem:[%s3823_s11 + $0x178] sm:$0xff]  ;;  %v1885_v12 = vld [vmem:[%s3829_s6 + $0x20] sm:$0xff]  ;;  %v1734_v13 = vld [vmem:[%s3823_s11 + $0x170] sm:$0xff] }
 0x86c   : > { %1789 = vmatpush1.msra.mxu0 %v1694_v26  ;;  %1962 = vmatpush1.msra.mxu1 %v1895_v57  ;;  %v1884_v14 = vld [vmem:[%s3829_s6 + $0x18] sm:$0xff]  ;;  %v1733_v15 = vld [vmem:[%s3823_s11 + $0x168] sm:$0xff]  ;;  %v1883_v16 = vld [vmem:[%s3829_s6 + $0x10] sm:$0xff] }
 0x86d   : > { %1790 = vmatprep.subr.mxu0 %v1693_v28  ;;  %1963 = vmatprep.subr.mxu1 %v1894_v59  ;;  %v1732_v17 = vld [vmem:[%s3823_s11 + $0x160] sm:$0xff]  ;;  %v1731_v18 = vld [vmem:[%s3823_s11 + $0x158] sm:$0xff]  ;;  %v1730_v19 = vld [vmem:[%s3823_s11 + $0x150] sm:$0xff] }
 0x86e   : > { %1791 = vmatpush1.msra.mxu0 %v1692_v30  ;;  %1964 = vmatpush1.msra.mxu1 %v1893_v62  ;;  %v1729_v20 = vld [vmem:[%s3823_s11 + $0x148] sm:$0xff]  ;;  %v1728_v21 = vld [vmem:[%s3823_s11 + $0x140] sm:$0xff]  ;;  %v1727_v22 = vld [vmem:[%s3823_s11 + $0x138] sm:$0xff] }
 0x86f   : > { %1792 = vmatprep.subr.mxu0 %v1691_v32  ;;  %1965 = vmatprep.subr.mxu1 %v1892_v1  ;;  %v1726_v23 = vld [vmem:[%s3823_s11 + $0x130] sm:$0xff]  ;;  %v1725_v24 = vld [vmem:[%s3823_s11 + $0x128] sm:$0xff]  ;;  %v1724_v25 = vld [vmem:[%s3823_s11 + $0x120] sm:$0xff] }
 0x870   : > { %1793 = vmatpush1.msra.mxu0 %v1690_v34  ;;  %1966 = vmatpush1.msra.mxu1 %v1891_v3  ;;  %v1723_v26 = vld [vmem:[%s3823_s11 + $0x118] sm:$0xff]  ;;  %v1722_v27 = vld [vmem:[%s3823_s11 + $0x110] sm:$0xff]  ;;  %v1721_v28 = vld [vmem:[%s3823_s11 + $0x108] sm:$0xff]  ;;  %v1754_v3 = vlaneseq }
 0x871   : > { %1794 = vmatprep.subr.mxu0 %v1689_v36  ;;  %1967 = vmatprep.subr.mxu1 %v1890_v63  ;;  %v1720_v29 = vld [vmem:[%s3823_s11 + $0x100] sm:$0xff]  ;;  %v1882_v30 = vld [vmem:[%s3829_s6 + $0x8] sm:$0xff]  ;;  %v1944_v32 = vld [vmem:[%s3829_s6 + $0x1f8] sm:$0xff] }
 0x872   : > { %1795 = vmatpush1.msra.mxu0 %v1688_v38  ;;  %1968 = vmatpush1.msra.mxu1 %v1889_v5  ;;  %v1881_v31 = vld [vmem:[%s3829_s6] sm:$0xff]  ;;  %v1943_v33 = vld [vmem:[%s3829_s6 + $0x1f0] sm:$0xff]  ;;  %v1942_v34 = vld [vmem:[%s3829_s6 + $0x1e8] sm:$0xff] }
 0x873   : > { %1796 = vmatprep.subr.mxu0 %v1751_v40  ;;  %1969 = vmatprep.subr.mxu1 %v1888_v53  ;;  %v1938_v35 = vld [vmem:[%s3829_s6 + $0x1c8] sm:$0xff]  ;;  %v1937_v36 = vld [vmem:[%s3829_s6 + $0x1c0] sm:$0xff]  ;;  %v1936_v37 = vld [vmem:[%s3829_s6 + $0x1b8] sm:$0xff] }
 0x874   : > { %1797 = vmatpush2.msra.mxu0 %v1750_v42  ;;  %1970 = vmatpush1.msra.mxu1 %v1887_v8  ;;  %v1935_v38 = vld [vmem:[%s3829_s6 + $0x1b0] sm:$0xff]  ;;  %v1934_v39 = vld [vmem:[%s3829_s6 + $0x1a8] sm:$0xff]  ;;  %v1933_v40 = vld [vmem:[%s3829_s6 + $0x1a0] sm:$0xff] }
 0x875   : > { %1798 = vmatprep.subr.mxu0 %v1749_v44  ;;  %1971 = vmatprep.subr.mxu1 %v1886_v10  ;;  %v1932_v41 = vld [vmem:[%s3829_s6 + $0x198] sm:$0xff]  ;;  %v1931_v42 = vld [vmem:[%s3829_s6 + $0x190] sm:$0xff]  ;;  %v1930_v43 = vld [vmem:[%s3829_s6 + $0x188] sm:$0xff] }
 0x876   : > { %1799 = vmatpush2.msra.mxu0 %v1748_v46  ;;  %1972 = vmatpush1.msra.mxu1 %v1885_v12  ;;  %v1929_v44 = vld [vmem:[%s3829_s6 + $0x180] sm:$0xff]  ;;  %v1928_v45 = vld [vmem:[%s3829_s6 + $0x178] sm:$0xff]  ;;  %v1927_v46 = vld [vmem:[%s3829_s6 + $0x170] sm:$0xff] }
 0x877   : > { %1800 = vmatprep.subr.mxu0 %v1747_v48  ;;  %1973 = vmatprep.subr.mxu1 %v1884_v14  ;;  %v1926_v47 = vld [vmem:[%s3829_s6 + $0x168] sm:$0xff]  ;;  %v1925_v48 = vld [vmem:[%s3829_s6 + $0x160] sm:$0xff]  ;;  %v1924_v49 = vld [vmem:[%s3829_s6 + $0x158] sm:$0xff] }
 0x878   : > { %1801 = vmatpush2.msra.mxu0 %v1746_v50  ;;  %1974 = vmatpush1.msra.mxu1 %v1883_v16  ;;  %v1923_v50 = vld [vmem:[%s3829_s6 + $0x150] sm:$0xff]  ;;  %v1922_v51 = vld [vmem:[%s3829_s6 + $0x148] sm:$0xff]  ;;  %v1920_v57 = vld [vmem:[%s3829_s6 + $0x138] sm:$0xff] }
 0x879   : > { %1802 = vmatprep.subr.mxu0 %v1745_v56  ;;  %1975 = vmatprep.subr.mxu1 %v1882_v30  ;;  %v1921_v56 = vld [vmem:[%s3829_s6 + $0x140] sm:$0xff]  ;;  %v1918_v59 = vld [vmem:[%s3829_s6 + $0x128] sm:$0xff]  ;;  %v1916_v62 = vld [vmem:[%s3829_s6 + $0x118] sm:$0xff] }
 0x87a   : > { %1803 = vmatpush2.msra.mxu0 %v1744_v58  ;;  %1976 = vmatpush1.msra.mxu1 %v1881_v31  ;;  %v1919_v58 = vld [vmem:[%s3829_s6 + $0x130] sm:$0xff]  ;;  %v1914_v1 = vld [vmem:[%s3829_s6 + $0x108] sm:$0xff] }
 0x87b   : > { %1804 = vmatprep.subr.mxu0 %v1743_v60  ;;  %1977 = vmatprep.subr.mxu1 %v1944_v32  ;;  %v1917_v60 = vld [vmem:[%s3829_s6 + $0x120] sm:$0xff] }
 0x87c   : > { %1805 = vmatpush2.msra.mxu0 %v1742_v0  ;;  %1978 = vmatpush2.msra.mxu1 %v1943_v33  ;;  %v1915_v0 = vld [vmem:[%s3829_s6 + $0x110] sm:$0xff] }
 0x87d   : > { %1806 = vmatprep.subr.mxu0 %v1741_v2  ;;  %1979 = vmatprep.subr.mxu1 %v1942_v34  ;;  %v1913_v2 = vld [vmem:[%s3829_s6 + $0x100] sm:$0xff] }
 0x87e   : > { %1807 = vmatpush2.msra.mxu0 %v1740_v61  ;;  %v1755_v61 = vshrl.u32 %v1754_v3, 7 }
 0x87f   : > { %1808 = vmatprep.subr.mxu0 %v1739_v4  ;;  %v1752_v4 = vld [vmem:[%s943_s12] sm:$0x3] }
 0x880   : > { %1809 = vmatpush2.msra.mxu0 %v1738_v6  ;;  %v1756_v63 = vsub.s32 0, %v1755_v61  ;;  %v1760_v5 = vsub.s32 1, %v1755_v61 }
 0x881   : > { %1810 = vmatprep.subr.mxu0 %v1737_v7 }
 0x882   : > { %1811 = vmatpush2.msra.mxu0 %v1736_v9  ;;  %v1757_v6 = vrot.slane %v1752_v4, %v1756_v63  ;;  %v1761_v53 = vrot.slane %v1752_v4, %v1760_v5 }
 0x883   : > { %1812 = vmatprep.subr.mxu0 %v1735_v11 }
 0x884   : > { %1813 = vmatpush2.msra.mxu0 %v1734_v13 }
 0x885   : > { %1814 = vmatprep.subr.mxu0 %v1733_v15 }
 0x886   : > { %1815 = vmatpush2.msra.mxu0 %v1732_v17 }
 0x887   : > { %1816 = vmatprep.subr.mxu0 %v1731_v18 }
 0x888   : > { %1817 = vmatpush2.msra.mxu0 %v1730_v19 }
 0x889   : > { %1818 = vmatprep.subr.mxu0 %v1729_v20 }
 0x88a   : > { %1819 = vmatpush2.msra.mxu0 %v1728_v21 }
 0x88b   : > { %1820 = vmatprep.subr.mxu0 %v1727_v22 }
 0x88c   : > { %1821 = vmatpush2.msra.mxu0 %v1726_v23 }
 0x88d   : > { %1822 = vmatprep.subr.mxu0 %v1725_v24 }
 0x88e   : > { %1823 = vmatpush2.msra.mxu0 %v1724_v25 }
 0x88f   : > { %1824 = vmatprep.subr.mxu0 %v1723_v26 }
 0x890   : > { %1825 = vmatpush2.msra.mxu0 %v1722_v27 }
 0x891   : > { %1826 = vmatprep.subr.mxu0 %v1721_v28 }
 0x892   : > { %1827 = vmatpush2.msra.mxu0 %v1720_v29 }
 0x893   : > { %1829 = vmatmul.mubr.f32.vlgmr.msra.gmra.mxu0 %v3864_v52  ;;  %v1941_v52 = vld [vmem:[%s3829_s6 + $0x1e0] sm:$0xff] }
 0x894   : > { %1834 = vmatprep.mubr.f32.mxu0 %v3870_v55  ;;  %1980 = vmatpush2.msra.mxu1 %v1941_v52  ;;  %v1939_v55 = vld [vmem:[%s3829_s6 + $0x1d0] sm:$0xff] }
 0x897   : > { %1835 = vmatmul.mubr.f32.gmra.mxu0 %v3868_v54  ;;  %v1940_v54 = vld [vmem:[%s3829_s6 + $0x1d8] sm:$0xff] }
 0x898   : > { %1981 = vmatprep.subr.mxu1 %v1940_v54 }
 0x899   : > { %1982 = vmatpush2.msra.mxu1 %v1939_v55 }
 0x89a   : > { %1983 = vmatprep.subr.mxu1 %v1938_v35 }
 0x89b   : > { %1984 = vmatpush2.msra.mxu1 %v1937_v36 }
 0x89c   : > { %1985 = vmatprep.subr.mxu1 %v1936_v37 }
 0x89d   : > { %1986 = vmatpush2.msra.mxu1 %v1935_v38 }
 0x89e   : > { %1987 = vmatprep.subr.mxu1 %v1934_v39 }
 0x89f   : > { %1988 = vmatpush2.msra.mxu1 %v1933_v40 }
 0x8a0   : > { %1989 = vmatprep.subr.mxu1 %v1932_v41 }
 0x8a1   : > { %1990 = vmatpush2.msra.mxu1 %v1931_v42 }
 0x8a2   : > { %1991 = vmatprep.subr.mxu1 %v1930_v43 }
 0x8a3   : > { %1992 = vmatpush2.msra.mxu1 %v1929_v44 }
 0x8a4   : > { %1993 = vmatprep.subr.mxu1 %v1928_v45 }
 0x8a5   : > { %1994 = vmatpush2.msra.mxu1 %v1927_v46 }
 0x8a6   : > { %1995 = vmatprep.subr.mxu1 %v1926_v47 }
 0x8a7   : > { %1996 = vmatpush2.msra.mxu1 %v1925_v48  ;;  %v1877_v48 = vld [vmem:[#allocation3] sm:$0xff] }
 0x8a8   : > { %1997 = vmatprep.subr.mxu1 %v1924_v49 }
 0x8a9   : > { %1998 = vmatpush2.msra.mxu1 %v1923_v50  ;;  %v1878_v50 = vld [vmem:[#allocation3 + $0x18] sm:$0xff] }
 0x8aa   : > { %1999 = vmatprep.subr.mxu1 %v1922_v51 }
 0x8ab   : > { %2000 = vmatpush2.msra.mxu1 %v1921_v56 }
 0x8ac   : > { %2001 = vmatprep.subr.mxu1 %v1920_v57  ;;  %v1879_v57 = vld [vmem:[#allocation3 + $0x8] sm:$0xff] }
 0x8ad   : > { %2002 = vmatpush2.msra.mxu1 %v1919_v58 }
 0x8ae   : > { %2003 = vmatprep.subr.mxu1 %v1918_v59 }
 0x8af   : > { %2004 = vmatpush2.msra.mxu1 %v1917_v60  ;;  %v1880_v60 = vld [vmem:[#allocation3 + $0x10] sm:$0xff] }
 0x8b0   : > { %2005 = vmatprep.subr.mxu1 %v1916_v62 }
 0x8b1   : > { %2006 = vmatpush2.msra.mxu1 %v1915_v0 }
 0x8b2   : > { %2007 = vmatprep.subr.mxu1 %v1914_v1 }
 0x8b3   : > { %2008 = vmatpush2.msra.mxu1 %v1913_v2 }
 0x953   : > { %v1830_v7 = vpop.f32.mrf.mxu0 }
 0x954   : > { %v1831_v8 = vadd.f32 %v1830_v7, %v1757_v6 }
 0x955   : > { %v1832_v9 = vpop.f32.mrf.mxu0 }
 0x956   : > { %v1845_v10 = vmul.f32 0.044715, %v1831_v8  ;;  %v1833_v11 = vadd.f32 %v1832_v9, %v1761_v53  ;;  %v1841_v38 = vmul.f32 0.5, %v1831_v8 }
 0x957   : > { %v1836_v12 = vpop.f32.mrf.mxu0 }
 0x958   : > { %v1849_v13 = vmul.f32 %v1845_v10, %v1831_v8  ;;  %v1837_v14 = vadd.f32 %v1836_v12, %v1757_v6  ;;  %v1846_v15 = vmul.f32 0.044715, %v1833_v11  ;;  %v1842_v35 = vmul.f32 0.5, %v1833_v11 }
 0x959   : > { %v1838_v16 = vpop.f32.mrf.mxu0 }
 0x95a   : > { %v1847_v17 = vmul.f32 0.044715, %v1837_v14  ;;  %v1839_v18 = vadd.f32 %v1838_v16, %v1761_v53  ;;  %v1850_v19 = vmul.f32 %v1846_v15, %v1833_v11  ;;  %v1853_v20 = vmul.f32 %v1849_v13, %v1831_v8 }
 0x95b   : > { %v1843_v45 = vmul.f32 0.5, %v1837_v14 }
 0x95c   : > { %v1851_v21 = vmul.f32 %v1847_v17, %v1837_v14  ;;  %v1848_v22 = vmul.f32 0.044715, %v1839_v18  ;;  %v1854_v23 = vmul.f32 %v1850_v19, %v1833_v11  ;;  %v1857_v24 = vadd.f32 %v1853_v20, %v1831_v8 }
 0x95d   : > { %v1844_v43 = vmul.f32 0.5, %v1839_v18 }
 0x95e   : > { %v1852_v25 = vmul.f32 %v1848_v22, %v1839_v18  ;;  %v1858_v26 = vadd.f32 %v1854_v23, %v1833_v11  ;;  %v1861_v27 = vmul.f32 0.7978846, %v1857_v24  ;;  %v1855_v28 = vmul.f32 %v1851_v21, %v1837_v14 }
 0x960   : > { %v1862_v29 = vmul.f32 0.7978846, %v1858_v26  ;;  %2762 = vtanh.f32 %v1861_v27  ;;  %v1856_v30 = vmul.f32 %v1852_v25, %v1839_v18  ;;  %v1859_v31 = vadd.f32 %v1855_v28, %v1837_v14 }
 0x962   : > { %2764 = vtanh.f32 %v1862_v29  ;;  %v1860_v32 = vadd.f32 %v1856_v30, %v1839_v18  ;;  %v1863_v33 = vmul.f32 0.7978846, %v1859_v31 }
 0x964   : > { %v1864_v34 = vmul.f32 0.7978846, %v1860_v32  ;;  %2766 = vtanh.f32 %v1863_v33 }
 0x966   : > { %2768 = vtanh.f32 %v1864_v34 }
 0x96d   : > { %v2763_v52 = vpop.eup %2762 }
 0x96e   : > { %v1869_v55 = vadd.f32 1.0, %v2763_v52 }
 0x96f   : > { %v2765_v54 = vpop.eup %2764 }
 0x970   : > { %v1870_v36 = vadd.f32 1.0, %v2765_v54  ;;  %v1873_v41 = vmul.f32 %v1869_v55, %v1841_v38 }
 0x971   : > { %v2767_v37 = vpop.eup %2766 }
 0x972   : > { %v1874_v39 = vmul.f32 %v1870_v36, %v1842_v35  ;;  %v1871_v42 = vadd.f32 1.0, %v2767_v37 }
 0x973   : > { %v2769_v40 = vpop.eup %2768 }
 0x974   : > { %2009 = vmatprep.mubr.f32.mxu1 %v1874_v39  ;;  %v1872_v44 = vadd.f32 1.0, %v2769_v40  ;;  %v1875_v47 = vmul.f32 %v1871_v42, %v1843_v45 }
 0x975   : > { %2010 = vmatmul.mubr.f32.vlgmr.msra.gmra.mxu1 %v1873_v41 }
 0x976   : > { %v1876_v46 = vmul.f32 %v1872_v44, %v1844_v43 }
 0x978   : > { %2015 = vmatprep.mubr.f32.mxu1 %v1876_v46 }
 0x979   : > { %2016 = vmatmul.mubr.f32.gmra.mxu1 %v1875_v47 }
 0xa35   : > { %v2011_v49 = vpop.f32.mrf.mxu1 }
 0xa36   : > { %v2022_v51 = vadd.f32 %v2011_v49, %v1877_v48 }
 0xa37   : > { %v2013_v56 = vpop.f32.mrf.mxu1 }
 0xa38   : > { %2026 = vst [vmem:[#allocation3] sm:$0xff] %v2022_v51  ;;  %v2023_v58 = vadd.f32 %v2013_v56, %v1878_v50 }
 0xa39   : > { %v2017_v59 = vpop.f32.mrf.mxu1 }
 0xa3a   : > { %2027 = vst [vmem:[#allocation3 + $0x18] sm:$0xff] %v2023_v58  ;;  %v2024_v62 = vadd.f32 %v2017_v59, %v1879_v57 }
 0xa3b   : > { %v2019_v0 = vpop.f32.mrf.mxu1 }
 0xa3c   : > { %2028 = vst [vmem:[#allocation3 + $0x8] sm:$0xff] %v2024_v62  ;;  %v2025_v1 = vadd.f32 %v2019_v0, %v1880_v60 }
 0xa3e   : > { %2029 = vst [vmem:[#allocation3 + $0x10] sm:$0xff] %v2025_v1 }
 0xa3f PF: > { %s4400_s12 = sld [smem:[#allocation39_spill]] }
 0xa45   : > { %p2449_p4 = scmp.ne.s32.totalorder %s4400_s12, 5 }
 0xa46   : > { %s4401_s24 = sld [smem:[#allocation62_spill]] (!%p2449_p4)  ;;  %s4402_s0 = scalar_lea.vmem (!%p2449_p4), [#allocation10], %s3782_s20 }
 0xa47   : > { %2033 = sbr.rel (%p2449_p4) target bundleno = 2652 (0xa5c), region = 144 }
 0xa4c   : > { %v2040_v2 = vlaneseq  ;;  %v2038_v61 = vld [vmem:[%s4401_s24] sm:$0x3]  ;;  %v2058_v63 = vld [vmem:[%s4402_s0] sm:$0x3]  ;;  %v2035_v53 = vld [vmem:[#allocation3 + $0x18] sm:$0xff] }
 0xa4d   : > { %v2034_v4 = vld [vmem:[#allocation3] sm:$0xff]  ;;  %v2036_v7 = vld [vmem:[#allocation3 + $0x8] sm:$0xff]  ;;  %v2037_v8 = vld [vmem:[#allocation3 + $0x10] sm:$0xff] }
 0xa4e   : > { %v2041_v3 = vshrl.u32 %v2040_v2, 7  ;;  %v2054_v14 = vld [vmem:[%s3773_s14] sm:$0xff]  ;;  %v2055_v18 = vld [vmem:[%s3773_s14 + $0x8] sm:$0xff]  ;;  %v2056_v19 = vld [vmem:[%s3773_s14 + $0x10] sm:$0xff] }
 0xa4f   : > { %v2057_v20 = vld [vmem:[%s3773_s14 + $0x18] sm:$0xff] }
 0xa50   : > { %v2042_v5 = vsub.s32 0, %v2041_v3  ;;  %v2046_v6 = vsub.s32 1, %v2041_v3 }
 0xa52   : > { %v2043_v9 = vrot.slane %v2038_v61, %v2042_v5  ;;  %v2063_v10 = vrot.slane %v2058_v63, %v2042_v5  ;;  %v2047_v11 = vrot.slane %v2038_v61, %v2046_v6  ;;  %v2067_v12 = vrot.slane %v2058_v63, %v2046_v6 }
 0xa54   : > { %v2050_v13 = vadd.f32 %v2043_v9, %v2034_v4  ;;  %v2051_v15 = vadd.f32 %v2047_v11, %v2035_v53  ;;  %v2052_v16 = vadd.f32 %v2043_v9, %v2036_v7  ;;  %v2053_v17 = vadd.f32 %v2047_v11, %v2037_v8 }
 0xa56   : > { %v2070_v21 = vmul.f32 %v2063_v10, %v2050_v13  ;;  %v2071_v22 = vmul.f32 %v2067_v12, %v2051_v15  ;;  %v2072_v23 = vmul.f32 %v2063_v10, %v2052_v16  ;;  %v2073_v24 = vmul.f32 %v2067_v12, %v2053_v17 }
 0xa58   : > { %v2074_v25 = vadd.f32 %v2070_v21, %v2054_v14  ;;  %v2075_v26 = vadd.f32 %v2071_v22, %v2055_v18  ;;  %v2076_v27 = vadd.f32 %v2072_v23, %v2056_v19  ;;  %v2077_v28 = vadd.f32 %v2073_v24, %v2057_v20 }
 0xa5a   : > { %2078 = vst [vmem:[%s3853_s2] sm:$0xff] %v2074_v25  ;;  %2079 = vst [vmem:[%s3853_s2 + $0x8] sm:$0xff] %v2075_v26 }
 0xa5b   : > { %2080 = vst [vmem:[%s3853_s2 + $0x10] sm:$0xff] %v2076_v27  ;;  %2081 = vst [vmem:[%s3853_s2 + $0x18] sm:$0xff] %v2077_v28 }
 0xa5c PF: > { %s4403_s20 = sld [smem:[#allocation40_spill]]  ;;  %s2096_s28 = sshll.u32 %s3853_s2, 4  ;;  %s4185_s28 = int_to_ptr.vmem [resolvable:$true] %s2096_s28 }
 0xa5d   : > { %s4404_s15 = sld [smem:[#allocation44_spill]]  ;;  %s2083_s5 = scalar_lea.sflag [#allocation6], %s3766_s7 }
 0xa5e   : > { %s4405_s9 = sld [smem:[#allocation63_spill]]  ;;  %s3098_s13 = scalar_lea.vmem %s4185_s28, 512 }
 0xa5f   : > { %p3099_p6 = scmp.ne.s32.totalorder %s4185_s28, %s3098_s13  ;;  %s3302_s1 = smov [#allocation22]  }
 0xa60   : > { %s3102_s27 = sshll.u32 %s3302_s1, 4  ;;  %s3103_s27 = int_to_ptr.vmem [resolvable:$false] %s3102_s27 }
 0xa61   : > { %s3104_s4 = scalar_lea.vmem %s3103_s27, 1024  ;;  %p3105_p1 = scmp.lt.s32.totalorder %s4185_s28, %s3103_s27 }
 0xa62   : > { %s2463_s25 = sshll.u32 %s4403_s20, 9  ;;  %p3106_p2 = scmp.lt.s32.totalorder %s3104_s4, %s3098_s13 }
 0xa63   : > { %p4406_p3 = scmp.ne.s32.totalorder %s4404_s15, 0 }
 0xa64   : > { %s4182_s3 = scalar_lea.hbm %s4405_s9, %s2463_s25  ;;  %p3107_p0 = por %p3106_p2, %p3105_p1 }
 0xa65   : > { %p3100_p8 = pnand %p3099_p6, %p4406_p3 }
 0xa67   : > { %p3101_p10 = pneg %p3100_p8 }
 0xa69   : > { %p3108_p11 = pnand %p3107_p0, %p3101_p10 }
 0xa6b   : > { %3111 = shalt.err (!%p3108_p11)
}
 0xa6c   : > { %s3112_s2 = scalar_lea.hbm %s4182_s3, 512  ;;  %s3116_s8 = scalar_lea.hbm %s4405_s9, 1024 }
 0xa6d   : > { %p3113_p7 = scmp.ne.s32.totalorder %s4182_s3, %s3112_s2  ;;  %p3117_p13 = scmp.lt.s32.totalorder %s4182_s3, %s4405_s9 }
 0xa6e   : > { %p3118_p9 = scmp.lt.s32.totalorder %s3116_s8, %s3112_s2 }
 0xa6f   : > { %p3114_p12 = pnand %p3113_p7, %p4406_p3 }
 0xa70   : > { %p3119_p4 = por %p3118_p9, %p3117_p13 }
 0xa71   : > { %p3115_p5 = pneg %p3114_p12 }
 0xa73   : > { %p3120_p6 = pnand %p3119_p4, %p3115_p5 }
 0xa75   : > { %3123 = shalt.err (!%p3120_p6)
}
 0xa76   : > { %s3303_s18 = smov 256   ;;  %s3304_s24 = smov 16  }
 0xa77   : > { %2560 = dma.vmem_to_hbm [thread:$0]  (%p4406_p3), %s4185_s28, 512, %s4182_s3, %s2083_s5, %s3303_s18, %s3303_s18, %s3304_s24  }
 0xa78 PF: > { %s4407_s0 = sld [smem:[#allocation37_spill]]  ;;  %p2613_p8 = scmp.ge.s32.totalorder %s3278_s16, 2 }
 0xa79   : > { %s4408_s20 = sld [smem:[#allocation45_spill]] }
 0xa7e   : > { %s2111_s25 = sand.u32 1, %s4407_s0  }
 0xa7f   : > { %p4409_p10 = scmp.ne.s32.totalorder %s4408_s20, 0  ;;  %s2112_s17 = scalar_lea.sflag [#allocation6], %s2111_s25 }
 0xa81   : > { %p2601_p1 = pnand %p2613_p8, %p4409_p10 }
 0xa83   : > { %p2602_p2 = pneg %p2601_p1 }
 0xa85   : > { %3221 = dma.done.wait (%p2602_p2), %s2112_s17, 512  }
 0xa86   : > { %3223 = vsyncadd (%p2602_p2), %s2112_s17, 4294966784  ;;  %s39_s16 = sadd.s32 1, %s3278_s16   ;;  %s4411_s18 = sld [smem:[#allocation35_spill]] }
 0xa87   : > { %p4215_p0 = scmp.ge.s32.totalorder %s39_s16, 14   ;;  %s4412_s19 = sld [smem:[#allocation36_spill]] }
 0xa88   : > { %s4413_s7 = smov %s3658_s21  ;;  %s4414_s24 = sld [smem:[#allocation38_spill]] }
 0xa89   : > { %s4415_s15 = sld [smem:[#allocation46_spill]]  ;;  %s4418_s20 = smov %s4439_s10 }
 0xa8a   : > { %s4416_s3 = sld [smem:[#allocation47_spill]]  ;;  %s4419_s21 = smov %s3242_s22 }
 0xa8b   : > { %s4417_s5 = sld [smem:[#allocation43_spill]]  ;;  %s4420_s22 = smov %s3246_s23 }
 0xa8c   : > { %s4421_s23 = smov %s4413_s7  ;;  %s4422_s25 = smov %s3258_s26 }
 0xa8d   : > { %s4424_s27 = smov %s3270_s29  ;;  %s4425_s28 = smov %s3274_s30 }
 0xa8e   :  { %38 = sbr.rel (!%p4215_p0) target bundleno = 33 (0x21), region = 244 }
 0xa8f   : > { %s4423_s26 = smov %s4415_s15 }
 0xa90   : > { %s4426_s29 = smov %s4416_s3 }
 0xa91   : > { %s4427_s30 = smov %s4417_s5 }
 0xa93   :  { %2117 = vsyncpa [#allocation5], 1 }
 0xa94   :  { %2119 = vsyncpa [#allocation5 + $0x1], 1 }
 0xa95   :  { %2120 = vsyncpa [#allocation8], 1 }
 0xa96   :  { %2122 = vsyncpa [#allocation8 + $0x1], 1 }
 0xa97   :  { %2123 = vsyncpa [#allocation11], 1 }
 0xa98   :  { %2125 = vsyncpa [#allocation11 + $0x1], 1 }
 0xa99   :  { %2126 = vsyncpa [#allocation14], 1 }
 0xa9a   :  { %2127 = vsyncpa [#allocation17], 1 }
 0xa9b   :  { %2128 = vsyncpa [#allocation6], 1 }
 0xa9c   :  { %2130 = vsyncpa [#allocation6 + $0x1], 1 }

</bundles_post_ra>
